<compile_context>
chip_gen: v7x
topology: tpu7x:2x2x1
jax: 0.10.0
libtpu: 0.0.40
codegen_flags: <defaults>
</compile_context>

<pallas_src>
import functools

import jax
import jax.numpy as jnp
from jax import lax
from jax.experimental import pallas as pl
from jax.experimental.pallas import tpu as pltpu

NEG_SLOPE = 0.001
C1, C2 = 24, 12            # hidden channel counts from the PyTorch module
LANE_TARGET = 2048         # lanes (B*HW_p) targeted per grid step


def _round_up(x, m):
    return (x + m - 1) // m * m


def _leaky(x):
    return jnp.where(x > 0, x, NEG_SLOPE * x)


def _fm2s_kernel(x_ref, mask_ref, w1_ref, b1_ref, w2_ref, b2_ref,
                 w3_ref, b3_ref, out_ref, patches_ref, *,
                 W, amp_p, c1_p, c2_p):
    L = out_ref.shape[-1]
    # Lane rotation per tap so rolled[:, j] = x[:, j + dy*W + dx]; the border
    # masks zero every destination whose source crosses a row / image boundary
    # (this includes all cross-image wrap positions in the batch-in-lane layout).
    shifts = [(ky - 1) * W + (kx - 1) for ky in range(3) for kx in range(3)]
    valid = [mask_ref[t] > 0.0 for t in range(9)]          # (1, L) bool each

    def conv3x3(x, cin_p, w_ref, b_ref):
        # Build im2col patches (9*cin_p, L) directly in the VMEM scratch.
        for t, d in enumerate(shifts):
            if d == 0:                                     # center tap: no shift
                tap = x
            else:
                tap = jnp.where(valid[t],
                                pltpu.roll(x, shift=(-d) % L, axis=1),
                                0.0)
            patches_ref[pl.ds(t * cin_p, cin_p), :] = tap
        y = jnp.dot(w_ref[...], patches_ref[pl.ds(0, 9 * cin_p), :],
                    preferred_element_type=jnp.float32)
        return y + b_ref[...]

    x = x_ref[...]                                          # (amp_p, L)
    y = _leaky(conv3x3(x, amp_p, w1_ref, b1_ref))
    y = _leaky(conv3x3(y, c1_p, w2_ref, b2_ref))
    y = conv3x3(y, c2_p, w3_ref, b3_ref)
    out_ref[...] = y.astype(out_ref.dtype)


def _prep_conv(w, b, cin_p, cout_p):
    """PyTorch (Cout, Cin, 3, 3)/(Cout,) -> (Cout_p, 9*Cin_p)/(Cout_p, 1).
    Contraction ordered (ky, kx, ci); padded channels get zero weights/bias."""
    cout, cin = w.shape[0], w.shape[1]
    w = jnp.pad(w, ((0, cout_p - cout), (0, cin_p - cin), (0, 0), (0, 0)))
    wm = jnp.transpose(w, (0, 2, 3, 1)).reshape(cout_p, 9 * cin_p)
    bm = jnp.pad(b.reshape(-1, 1), ((0, cout_p - cout), (0, 0)))
    return wm.astype(jnp.float32), bm.astype(jnp.float32)


def _border_masks(H, W, HW_p, B):
    """(9, 1, B*HW_p) f32 0/1 masks implementing the padding=1 zero border,
    tiled per image for the batch-in-lane layout; pad lanes are always 0."""
    yy = jnp.arange(H).reshape(H, 1)
    xx = jnp.arange(W).reshape(1, W)
    ms = []
    for ky in range(3):
        for kx in range(3):
            dy, dx = ky - 1, kx - 1
            m = ((yy + dy >= 0) & (yy + dy < H) &
                 (xx + dx >= 0) & (xx + dx < W)).reshape(H * W)
            ms.append(m)
    m9 = jnp.stack(ms, axis=0).astype(jnp.float32)          # (9, HW)
    m9 = jnp.pad(m9, ((0, 0), (0, HW_p - H * W)))            # pad lanes masked
    return jnp.tile(m9, (1, B)).reshape(9, 1, B * HW_p)


def fm2s_forward(x_nchw, params):
    """x_nchw: (N, amp, H, W) float32. Returns (N, amp, H, W)."""
    w1, b1, w2, b2, w3, b3 = params
    N, amp, H, W = x_nchw.shape
    HW = H * W
    HW_p = _round_up(HW, 128)          # lane-dense blocks for any image size

    amp_p = _round_up(amp, 8)
    c1_p = _round_up(C1, 8)
    c2_p = _round_up(C2, 8)
    patch_rows = 9 * max(amp_p, c1_p, c2_p)

    # Images per grid step: target ~LANE_TARGET lanes, but keep >= 2 grid steps
    # when N >= 2 so the "parallel" axis can feed both v7x TensorCores.
    B = max(1, min(LANE_TARGET // HW_p, N))
    if N >= 2:
        B = max(1, min(B, N // 2))
    Np = _round_up(N, B)
    L = B * HW_p

    # (N, amp, H, W) -> (amp_p, Np*HW_p): channels on sublanes, batch*spatial
    # flattened onto lanes.
    x = x_nchw.reshape(N, amp, HW).astype(jnp.float32)
    if HW_p != HW:
        x = jnp.pad(x, ((0, 0), (0, 0), (0, HW_p - HW)))
    x = jnp.transpose(x, (1, 0, 2))                          # (amp, N, HW_p)
    x = jnp.pad(x, ((0, amp_p - amp), (0, Np - N), (0, 0)))
    x = x.reshape(amp_p, Np * HW_p)

    w1m, b1m = _prep_conv(w1, b1, amp_p, c1_p)
    w2m, b2m = _prep_conv(w2, b2, c1_p, c2_p)
    w3m, b3m = _prep_conv(w3, b3, c2_p, amp_p)
    masks = _border_masks(H, W, HW_p, B)

    flops = 2 * Np * HW_p * 9 * (amp_p * c1_p + c1_p * c2_p + c2_p * amp_p)
    bytes_accessed = 4 * (2 * Np * amp_p * HW_p + int(masks.size)
                          + int(w1m.size) + int(w2m.size) + int(w3m.size)
                          + int(b1m.size) + int(b2m.size) + int(b3m.size))

    kernel = functools.partial(_fm2s_kernel, W=W, amp_p=amp_p, c1_p=c1_p,
                               c2_p=c2_p)

    out = pl.pallas_call(
        kernel,
        out_shape=jax.ShapeDtypeStruct((amp_p, Np * HW_p), jnp.float32),
        grid_spec=pltpu.PrefetchScalarGridSpec(
            num_scalar_prefetch=0,
            grid=(Np // B,),
            in_specs=[
                pl.BlockSpec((amp_p, L), lambda n: (0, n)),
                pl.BlockSpec((9, 1, L), lambda n: (0, 0, 0)),
                pl.BlockSpec((c1_p, 9 * amp_p), lambda n: (0, 0)),
                pl.BlockSpec((c1_p, 1), lambda n: (0, 0)),
                pl.BlockSpec((c2_p, 9 * c1_p), lambda n: (0, 0)),
                pl.BlockSpec((c2_p, 1), lambda n: (0, 0)),
                pl.BlockSpec((amp_p, 9 * c2_p), lambda n: (0, 0)),
                pl.BlockSpec((amp_p, 1), lambda n: (0, 0)),
            ],
            out_specs=pl.BlockSpec((amp_p, L), lambda n: (0, n)),
            scratch_shapes=[pltpu.VMEM((patch_rows, L), jnp.float32)],
        ),
        compiler_params=pltpu.CompilerParams(
            dimension_semantics=("parallel",)),
        cost_estimate=pl.CostEstimate(
            flops=flops, transcendentals=0, bytes_accessed=bytes_accessed),
    )(x, masks, w1m, b1m, w2m, b2m, w3m, b3m)

    out = out.reshape(amp_p, Np, HW_p)[:amp, :N, :HW]   # drop channel/batch/lane pads
    return jnp.transpose(out, (1, 0, 2)).reshape(N, amp, H, W)


def init_params(key, amp):
    """PyTorch Conv2d default init: U(-1/sqrt(fan_in), 1/sqrt(fan_in)),
    weights in PyTorch (Cout, Cin, 3, 3) layout, bias (Cout,)."""
    def conv_init(k, cin, cout):
        kw, kb = jax.random.split(k)
        bound = 1.0 / float(cin * 9) ** 0.5
        w = jax.random.uniform(kw, (cout, cin, 3, 3), jnp.float32, -bound, bound)
        b = jax.random.uniform(kb, (cout,), jnp.float32, -bound, bound)
        return w, b

    k1, k2, k3 = jax.random.split(key, 3)
    w1, b1 = conv_init(k1, amp, C1)
    w2, b2 = conv_init(k2, C1, C2)
    w3, b3 = conv_init(k3, C2, amp)
    return w1, b1, w2, b2, w3, b3


def reference_forward(x, params):
    """Pure-JAX reference (lax.conv, NCHW/OIHW) of the PyTorch forward."""
    w1, b1, w2, b2, w3, b3 = params

    def conv(x, w, b):
        y = lax.conv_general_dilated(
            x, w, window_strides=(1, 1), padding="SAME",
            dimension_numbers=("NCHW", "OIHW", "NCHW"))
        return y + b.reshape(1, -1, 1, 1)

    y = _leaky(conv(x, w1, b1))
    y = _leaky(conv(y, w2, b2))
    return conv(y, w3, b3)


if __name__ == "__main__":
    key = jax.random.PRNGKey(0)
    kx, kp = jax.random.split(key)

    amp = 4
    x = jax.random.normal(kx, (2, amp, 16, 16), dtype=jnp.float32)  # NCHW
    params = init_params(kp, amp)

    out = jax.block_until_ready(fm2s_forward(x, params))
    ref = reference_forward(x, params)

    assert out.shape == x.shape, (out.shape, x.shape)
    assert jnp.allclose(out, ref, atol=1e-4, rtol=1e-4), float(
        jnp.max(jnp.abs(out - ref)))

    print("KERNEL_OK")
</pallas_src>

<mosaic_0001>
module attributes {stable_mosaic.version = 11 : i64} {
  func.func @_fm2s_kernel(%arg0: i32, %arg1: memref<8x256xf32, #tpu.memory_space<vmem>>, %arg2: memref<9x1x256xf32, #tpu.memory_space<vmem>>, %arg3: memref<24x72xf32, #tpu.memory_space<vmem>>, %arg4: memref<24x1xf32, #tpu.memory_space<vmem>>, %arg5: memref<16x216xf32, #tpu.memory_space<vmem>>, %arg6: memref<16x1xf32, #tpu.memory_space<vmem>>, %arg7: memref<8x144xf32, #tpu.memory_space<vmem>>, %arg8: memref<8x1xf32, #tpu.memory_space<vmem>>, %arg9: memref<8x256xf32, #tpu.memory_space<vmem>>, %arg10: memref<216x256xf32, #tpu.memory_space<vmem>>) attributes {dimension_semantics = [#tpu.dimension_semantics<parallel>], iteration_bounds = array<i64: 2>, scalar_prefetch = 0 : i64, scratch_operands = 1 : i64, tpu.core_type = #tpu.core_type<tc>, window_params = [{transform_indices = @transform_0, window_bounds = array<i64: 8, 256>}, {pipeline_mode = #tpu.pipeline_mode<synchronous>, transform_indices = @transform_1, window_bounds = array<i64: 9, 1, 256>}, {pipeline_mode = #tpu.pipeline_mode<synchronous>, transform_indices = @transform_2, window_bounds = array<i64: 24, 72>}, {pipeline_mode = #tpu.pipeline_mode<synchronous>, transform_indices = @transform_3, window_bounds = array<i64: 24, 1>}, {pipeline_mode = #tpu.pipeline_mode<synchronous>, transform_indices = @transform_4, window_bounds = array<i64: 16, 216>}, {pipeline_mode = #tpu.pipeline_mode<synchronous>, transform_indices = @transform_5, window_bounds = array<i64: 16, 1>}, {pipeline_mode = #tpu.pipeline_mode<synchronous>, transform_indices = @transform_6, window_bounds = array<i64: 8, 144>}, {pipeline_mode = #tpu.pipeline_mode<synchronous>, transform_indices = @transform_7, window_bounds = array<i64: 8, 1>}, {transform_indices = @transform_8, window_bounds = array<i64: 8, 256>}]} {
    %c0 = arith.constant 0 : index
    %c0_0 = arith.constant 0 : index
    %c0_1 = arith.constant 0 : index
    %0 = vector.load %arg2[%c0, %c0_0, %c0_1] : memref<9x1x256xf32, #tpu.memory_space<vmem>>, vector<1x1x256xf32>
    %1 = vector.shape_cast %0 : vector<1x1x256xf32> to vector<1x256xf32>
    %cst = arith.constant 0.000000e+00 : f32
    %2 = vector.broadcast %cst : f32 to vector<1x256xf32>
    %3 = arith.cmpf ogt, %1, %2 : vector<1x256xf32>
    %c1 = arith.constant 1 : index
    %c0_2 = arith.constant 0 : index
    %c0_3 = arith.constant 0 : index
    %4 = vector.load %arg2[%c1, %c0_2, %c0_3] : memref<9x1x256xf32, #tpu.memory_space<vmem>>, vector<1x1x256xf32>
    %5 = vector.shape_cast %4 : vector<1x1x256xf32> to vector<1x256xf32>
    %cst_4 = arith.constant 0.000000e+00 : f32
    %6 = vector.broadcast %cst_4 : f32 to vector<1x256xf32>
    %7 = arith.cmpf ogt, %5, %6 : vector<1x256xf32>
    %c2 = arith.constant 2 : index
    %c0_5 = arith.constant 0 : index
    %c0_6 = arith.constant 0 : index
    %8 = vector.load %arg2[%c2, %c0_5, %c0_6] : memref<9x1x256xf32, #tpu.memory_space<vmem>>, vector<1x1x256xf32>
    %9 = vector.shape_cast %8 : vector<1x1x256xf32> to vector<1x256xf32>
    %cst_7 = arith.constant 0.000000e+00 : f32
    %10 = vector.broadcast %cst_7 : f32 to vector<1x256xf32>
    %11 = arith.cmpf ogt, %9, %10 : vector<1x256xf32>
    %c3 = arith.constant 3 : index
    %c0_8 = arith.constant 0 : index
    %c0_9 = arith.constant 0 : index
    %12 = vector.load %arg2[%c3, %c0_8, %c0_9] : memref<9x1x256xf32, #tpu.memory_space<vmem>>, vector<1x1x256xf32>
    %13 = vector.shape_cast %12 : vector<1x1x256xf32> to vector<1x256xf32>
    %cst_10 = arith.constant 0.000000e+00 : f32
    %14 = vector.broadcast %cst_10 : f32 to vector<1x256xf32>
    %15 = arith.cmpf ogt, %13, %14 : vector<1x256xf32>
    %c5 = arith.constant 5 : index
    %c0_11 = arith.constant 0 : index
    %c0_12 = arith.constant 0 : index
    %16 = vector.load %arg2[%c5, %c0_11, %c0_12] : memref<9x1x256xf32, #tpu.memory_space<vmem>>, vector<1x1x256xf32>
    %17 = vector.shape_cast %16 : vector<1x1x256xf32> to vector<1x256xf32>
    %cst_13 = arith.constant 0.000000e+00 : f32
    %18 = vector.broadcast %cst_13 : f32 to vector<1x256xf32>
    %19 = arith.cmpf ogt, %17, %18 : vector<1x256xf32>
    %c6 = arith.constant 6 : index
    %c0_14 = arith.constant 0 : index
    %c0_15 = arith.constant 0 : index
    %20 = vector.load %arg2[%c6, %c0_14, %c0_15] : memref<9x1x256xf32, #tpu.memory_space<vmem>>, vector<1x1x256xf32>
    %21 = vector.shape_cast %20 : vector<1x1x256xf32> to vector<1x256xf32>
    %cst_16 = arith.constant 0.000000e+00 : f32
    %22 = vector.broadcast %cst_16 : f32 to vector<1x256xf32>
    %23 = arith.cmpf ogt, %21, %22 : vector<1x256xf32>
    %c7 = arith.constant 7 : index
    %c0_17 = arith.constant 0 : index
    %c0_18 = arith.constant 0 : index
    %24 = vector.load %arg2[%c7, %c0_17, %c0_18] : memref<9x1x256xf32, #tpu.memory_space<vmem>>, vector<1x1x256xf32>
    %25 = vector.shape_cast %24 : vector<1x1x256xf32> to vector<1x256xf32>
    %cst_19 = arith.constant 0.000000e+00 : f32
    %26 = vector.broadcast %cst_19 : f32 to vector<1x256xf32>
    %27 = arith.cmpf ogt, %25, %26 : vector<1x256xf32>
    %c8 = arith.constant 8 : index
    %c0_20 = arith.constant 0 : index
    %c0_21 = arith.constant 0 : index
    %28 = vector.load %arg2[%c8, %c0_20, %c0_21] : memref<9x1x256xf32, #tpu.memory_space<vmem>>, vector<1x1x256xf32>
    %29 = vector.shape_cast %28 : vector<1x1x256xf32> to vector<1x256xf32>
    %cst_22 = arith.constant 0.000000e+00 : f32
    %30 = vector.broadcast %cst_22 : f32 to vector<1x256xf32>
    %31 = arith.cmpf ogt, %29, %30 : vector<1x256xf32>
    %c0_23 = arith.constant 0 : index
    %c0_24 = arith.constant 0 : index
    %32 = vector.load %arg1[%c0_23, %c0_24] : memref<8x256xf32, #tpu.memory_space<vmem>>, vector<8x256xf32>
    %c17_i32 = arith.constant 17 : i32
    %33 = tpu.dynamic_rotate %32 by %c17_i32 dim 1 : vector<8x256xf32>, i32 -> vector<8x256xf32>
    %cst_25 = arith.constant 0.000000e+00 : f32
    %34 = vector.shape_cast %3 : vector<1x256xi1> to vector<1x256xi1>
    %35 = vector.broadcast %34 : vector<1x256xi1> to vector<8x256xi1>
    %36 = vector.broadcast %cst_25 : f32 to vector<8x256xf32>
    %37 = arith.select %35, %33, %36 : vector<8x256xi1>, vector<8x256xf32>
    %c0_26 = arith.constant 0 : index
    %c0_27 = arith.constant 0 : index
    %38 = vector.load %arg10[%c0_26, %c0_27] : memref<216x256xf32, #tpu.memory_space<vmem>>, vector<8x256xf32>
    tpu.vector_store %arg10[%c0_26, %c0_27], %37 {strides = array<i32>} : memref<216x256xf32, #tpu.memory_space<vmem>>, vector<8x256xf32>,
    %c16_i32 = arith.constant 16 : i32
    %39 = tpu.dynamic_rotate %32 by %c16_i32 dim 1 : vector<8x256xf32>, i32 -> vector<8x256xf32>
    %cst_28 = arith.constant 0.000000e+00 : f32
    %40 = vector.shape_cast %7 : vector<1x256xi1> to vector<1x256xi1>
    %41 = vector.broadcast %40 : vector<1x256xi1> to vector<8x256xi1>
    %42 = vector.broadcast %cst_28 : f32 to vector<8x256xf32>
    %43 = arith.select %41, %39, %42 : vector<8x256xi1>, vector<8x256xf32>
    %c8_29 = arith.constant 8 : index
    %c0_30 = arith.constant 0 : index
    %44 = vector.load %arg10[%c8_29, %c0_30] : memref<216x256xf32, #tpu.memory_space<vmem>>, vector<8x256xf32>
    tpu.vector_store %arg10[%c8_29, %c0_30], %43 {strides = array<i32>} : memref<216x256xf32, #tpu.memory_space<vmem>>, vector<8x256xf32>,
    %c15_i32 = arith.constant 15 : i32
    %45 = tpu.dynamic_rotate %32 by %c15_i32 dim 1 : vector<8x256xf32>, i32 -> vector<8x256xf32>
    %cst_31 = arith.constant 0.000000e+00 : f32
    %46 = vector.shape_cast %11 : vector<1x256xi1> to vector<1x256xi1>
    %47 = vector.broadcast %46 : vector<1x256xi1> to vector<8x256xi1>
    %48 = vector.broadcast %cst_31 : f32 to vector<8x256xf32>
    %49 = arith.select %47, %45, %48 : vector<8x256xi1>, vector<8x256xf32>
    %c16 = arith.constant 16 : index
    %c0_32 = arith.constant 0 : index
    %50 = vector.load %arg10[%c16, %c0_32] : memref<216x256xf32, #tpu.memory_space<vmem>>, vector<8x256xf32>
    tpu.vector_store %arg10[%c16, %c0_32], %49 {strides = array<i32>} : memref<216x256xf32, #tpu.memory_space<vmem>>, vector<8x256xf32>,
    %c1_i32 = arith.constant 1 : i32
    %51 = tpu.dynamic_rotate %32 by %c1_i32 dim 1 : vector<8x256xf32>, i32 -> vector<8x256xf32>
    %cst_33 = arith.constant 0.000000e+00 : f32
    %52 = vector.shape_cast %15 : vector<1x256xi1> to vector<1x256xi1>
    %53 = vector.broadcast %52 : vector<1x256xi1> to vector<8x256xi1>
    %54 = vector.broadcast %cst_33 : f32 to vector<8x256xf32>
    %55 = arith.select %53, %51, %54 : vector<8x256xi1>, vector<8x256xf32>
    %c24 = arith.constant 24 : index
    %c0_34 = arith.constant 0 : index
    %56 = vector.load %arg10[%c24, %c0_34] : memref<216x256xf32, #tpu.memory_space<vmem>>, vector<8x256xf32>
    tpu.vector_store %arg10[%c24, %c0_34], %55 {strides = array<i32>} : memref<216x256xf32, #tpu.memory_space<vmem>>, vector<8x256xf32>,
    %c32 = arith.constant 32 : index
    %c0_35 = arith.constant 0 : index
    %57 = vector.load %arg10[%c32, %c0_35] : memref<216x256xf32, #tpu.memory_space<vmem>>, vector<8x256xf32>
    tpu.vector_store %arg10[%c32, %c0_35], %32 {strides = array<i32>} : memref<216x256xf32, #tpu.memory_space<vmem>>, vector<8x256xf32>,
    %c255_i32 = arith.constant 255 : i32
    %58 = tpu.dynamic_rotate %32 by %c255_i32 dim 1 : vector<8x256xf32>, i32 -> vector<8x256xf32>
    %cst_36 = arith.constant 0.000000e+00 : f32
    %59 = vector.shape_cast %19 : vector<1x256xi1> to vector<1x256xi1>
    %60 = vector.broadcast %59 : vector<1x256xi1> to vector<8x256xi1>
    %61 = vector.broadcast %cst_36 : f32 to vector<8x256xf32>
    %62 = arith.select %60, %58, %61 : vector<8x256xi1>, vector<8x256xf32>
    %c40 = arith.constant 40 : index
    %c0_37 = arith.constant 0 : index
    %63 = vector.load %arg10[%c40, %c0_37] : memref<216x256xf32, #tpu.memory_space<vmem>>, vector<8x256xf32>
    tpu.vector_store %arg10[%c40, %c0_37], %62 {strides = array<i32>} : memref<216x256xf32, #tpu.memory_space<vmem>>, vector<8x256xf32>,
    %c241_i32 = arith.constant 241 : i32
    %64 = tpu.dynamic_rotate %32 by %c241_i32 dim 1 : vector<8x256xf32>, i32 -> vector<8x256xf32>
    %cst_38 = arith.constant 0.000000e+00 : f32
    %65 = vector.shape_cast %23 : vector<1x256xi1> to vector<1x256xi1>
    %66 = vector.broadcast %65 : vector<1x256xi1> to vector<8x256xi1>
    %67 = vector.broadcast %cst_38 : f32 to vector<8x256xf32>
    %68 = arith.select %66, %64, %67 : vector<8x256xi1>, vector<8x256xf32>
    %c48 = arith.constant 48 : index
    %c0_39 = arith.constant 0 : index
    %69 = vector.load %arg10[%c48, %c0_39] : memref<216x256xf32, #tpu.memory_space<vmem>>, vector<8x256xf32>
    tpu.vector_store %arg10[%c48, %c0_39], %68 {strides = array<i32>} : memref<216x256xf32, #tpu.memory_space<vmem>>, vector<8x256xf32>,
    %c240_i32 = arith.constant 240 : i32
    %70 = tpu.dynamic_rotate %32 by %c240_i32 dim 1 : vector<8x256xf32>, i32 -> vector<8x256xf32>
    %cst_40 = arith.constant 0.000000e+00 : f32
    %71 = vector.shape_cast %27 : vector<1x256xi1> to vector<1x256xi1>
    %72 = vector.broadcast %71 : vector<1x256xi1> to vector<8x256xi1>
    %73 = vector.broadcast %cst_40 : f32 to vector<8x256xf32>
    %74 = arith.select %72, %70, %73 : vector<8x256xi1>, vector<8x256xf32>
    %c56 = arith.constant 56 : index
    %c0_41 = arith.constant 0 : index
    %75 = vector.load %arg10[%c56, %c0_41] : memref<216x256xf32, #tpu.memory_space<vmem>>, vector<8x256xf32>
    tpu.vector_store %arg10[%c56, %c0_41], %74 {strides = array<i32>} : memref<216x256xf32, #tpu.memory_space<vmem>>, vector<8x256xf32>,
    %c239_i32 = arith.constant 239 : i32
    %76 = tpu.dynamic_rotate %32 by %c239_i32 dim 1 : vector<8x256xf32>, i32 -> vector<8x256xf32>
    %cst_42 = arith.constant 0.000000e+00 : f32
    %77 = vector.shape_cast %31 : vector<1x256xi1> to vector<1x256xi1>
    %78 = vector.broadcast %77 : vector<1x256xi1> to vector<8x256xi1>
    %79 = vector.broadcast %cst_42 : f32 to vector<8x256xf32>
    %80 = arith.select %78, %76, %79 : vector<8x256xi1>, vector<8x256xf32>
    %c64 = arith.constant 64 : index
    %c0_43 = arith.constant 0 : index
    %81 = vector.load %arg10[%c64, %c0_43] : memref<216x256xf32, #tpu.memory_space<vmem>>, vector<8x256xf32>
    tpu.vector_store %arg10[%c64, %c0_43], %80 {strides = array<i32>} : memref<216x256xf32, #tpu.memory_space<vmem>>, vector<8x256xf32>,
    %c0_44 = arith.constant 0 : index
    %c0_45 = arith.constant 0 : index
    %82 = vector.load %arg3[%c0_44, %c0_45] : memref<24x72xf32, #tpu.memory_space<vmem>>, vector<24x72xf32>
    %c0_46 = arith.constant 0 : index
    %c0_47 = arith.constant 0 : index
    %83 = vector.load %arg10[%c0_46, %c0_47] : memref<216x256xf32, #tpu.memory_space<vmem>>, vector<72x256xf32>
    %cst_48 = arith.constant dense<0.000000e+00> : vector<24x256xf32>
    %84 = tpu.matmul %82, %83, %cst_48 {dimension_numbers = #tpu.dot_dimension_numbers<[1], [0], [0], [1], [0, 0, 1, 1], [], []>} : vector<24x72xf32>, vector<72x256xf32>, vector<24x256xf32> -> vector<24x256xf32>
    %c0_49 = arith.constant 0 : index
    %c0_50 = arith.constant 0 : index
    %85 = vector.load %arg4[%c0_49, %c0_50] : memref<24x1xf32, #tpu.memory_space<vmem>>, vector<24x1xf32>
    %86 = vector.broadcast %85 : vector<24x1xf32> to vector<24x256xf32>
    %87 = arith.addf %84, %86 : vector<24x256xf32>
    %cst_51 = arith.constant 0.000000e+00 : f32
    %88 = vector.broadcast %cst_51 : f32 to vector<24x256xf32>
    %89 = arith.cmpf ogt, %87, %88 : vector<24x256xf32>
    %cst_52 = arith.constant 1.000000e-03 : f32
    %90 = vector.broadcast %cst_52 : f32 to vector<24x256xf32>
    %91 = arith.mulf %90, %87 : vector<24x256xf32>
    %92 = arith.select %89, %87, %91 : vector<24x256xi1>, vector<24x256xf32>
    %c17_i32_53 = arith.constant 17 : i32
    %93 = tpu.dynamic_rotate %92 by %c17_i32_53 dim 1 : vector<24x256xf32>, i32 -> vector<24x256xf32>
    %cst_54 = arith.constant 0.000000e+00 : f32
    %94 = vector.shape_cast %3 : vector<1x256xi1> to vector<1x256xi1>
    %95 = vector.broadcast %94 : vector<1x256xi1> to vector<24x256xi1>
    %96 = vector.broadcast %cst_54 : f32 to vector<24x256xf32>
    %97 = arith.select %95, %93, %96 : vector<24x256xi1>, vector<24x256xf32>
    %c0_55 = arith.constant 0 : index
    %c0_56 = arith.constant 0 : index
    %98 = vector.load %arg10[%c0_55, %c0_56] : memref<216x256xf32, #tpu.memory_space<vmem>>, vector<24x256xf32>
    tpu.vector_store %arg10[%c0_55, %c0_56], %97 {strides = array<i32>} : memref<216x256xf32, #tpu.memory_space<vmem>>, vector<24x256xf32>,
    %c16_i32_57 = arith.constant 16 : i32
    %99 = tpu.dynamic_rotate %92 by %c16_i32_57 dim 1 : vector<24x256xf32>, i32 -> vector<24x256xf32>
    %cst_58 = arith.constant 0.000000e+00 : f32
    %100 = vector.shape_cast %7 : vector<1x256xi1> to vector<1x256xi1>
    %101 = vector.broadcast %100 : vector<1x256xi1> to vector<24x256xi1>
    %102 = vector.broadcast %cst_58 : f32 to vector<24x256xf32>
    %103 = arith.select %101, %99, %102 : vector<24x256xi1>, vector<24x256xf32>
    %c24_59 = arith.constant 24 : index
    %c0_60 = arith.constant 0 : index
    %104 = vector.load %arg10[%c24_59, %c0_60] : memref<216x256xf32, #tpu.memory_space<vmem>>, vector<24x256xf32>
    tpu.vector_store %arg10[%c24_59, %c0_60], %103 {strides = array<i32>} : memref<216x256xf32, #tpu.memory_space<vmem>>, vector<24x256xf32>,
    %c15_i32_61 = arith.constant 15 : i32
    %105 = tpu.dynamic_rotate %92 by %c15_i32_61 dim 1 : vector<24x256xf32>, i32 -> vector<24x256xf32>
    %cst_62 = arith.constant 0.000000e+00 : f32
    %106 = vector.shape_cast %11 : vector<1x256xi1> to vector<1x256xi1>
    %107 = vector.broadcast %106 : vector<1x256xi1> to vector<24x256xi1>
    %108 = vector.broadcast %cst_62 : f32 to vector<24x256xf32>
    %109 = arith.select %107, %105, %108 : vector<24x256xi1>, vector<24x256xf32>
    %c48_63 = arith.constant 48 : index
    %c0_64 = arith.constant 0 : index
    %110 = vector.load %arg10[%c48_63, %c0_64] : memref<216x256xf32, #tpu.memory_space<vmem>>, vector<24x256xf32>
    tpu.vector_store %arg10[%c48_63, %c0_64], %109 {strides = array<i32>} : memref<216x256xf32, #tpu.memory_space<vmem>>, vector<24x256xf32>,
    %c1_i32_65 = arith.constant 1 : i32
    %111 = tpu.dynamic_rotate %92 by %c1_i32_65 dim 1 : vector<24x256xf32>, i32 -> vector<24x256xf32>
    %cst_66 = arith.constant 0.000000e+00 : f32
    %112 = vector.shape_cast %15 : vector<1x256xi1> to vector<1x256xi1>
    %113 = vector.broadcast %112 : vector<1x256xi1> to vector<24x256xi1>
    %114 = vector.broadcast %cst_66 : f32 to vector<24x256xf32>
    %115 = arith.select %113, %111, %114 : vector<24x256xi1>, vector<24x256xf32>
    %c72 = arith.constant 72 : index
    %c0_67 = arith.constant 0 : index
    %116 = vector.load %arg10[%c72, %c0_67] : memref<216x256xf32, #tpu.memory_space<vmem>>, vector<24x256xf32>
    tpu.vector_store %arg10[%c72, %c0_67], %115 {strides = array<i32>} : memref<216x256xf32, #tpu.memory_space<vmem>>, vector<24x256xf32>,
    %c96 = arith.constant 96 : index
    %c0_68 = arith.constant 0 : index
    %117 = vector.load %arg10[%c96, %c0_68] : memref<216x256xf32, #tpu.memory_space<vmem>>, vector<24x256xf32>
    tpu.vector_store %arg10[%c96, %c0_68], %92 {strides = array<i32>} : memref<216x256xf32, #tpu.memory_space<vmem>>, vector<24x256xf32>,
    %c255_i32_69 = arith.constant 255 : i32
    %118 = tpu.dynamic_rotate %92 by %c255_i32_69 dim 1 : vector<24x256xf32>, i32 -> vector<24x256xf32>
    %cst_70 = arith.constant 0.000000e+00 : f32
    %119 = vector.shape_cast %19 : vector<1x256xi1> to vector<1x256xi1>
    %120 = vector.broadcast %119 : vector<1x256xi1> to vector<24x256xi1>
    %121 = vector.broadcast %cst_70 : f32 to vector<24x256xf32>
    %122 = arith.select %120, %118, %121 : vector<24x256xi1>, vector<24x256xf32>
    %c120 = arith.constant 120 : index
    %c0_71 = arith.constant 0 : index
    %123 = vector.load %arg10[%c120, %c0_71] : memref<216x256xf32, #tpu.memory_space<vmem>>, vector<24x256xf32>
    tpu.vector_store %arg10[%c120, %c0_71], %122 {strides = array<i32>} : memref<216x256xf32, #tpu.memory_space<vmem>>, vector<24x256xf32>,
    %c241_i32_72 = arith.constant 241 : i32
    %124 = tpu.dynamic_rotate %92 by %c241_i32_72 dim 1 : vector<24x256xf32>, i32 -> vector<24x256xf32>
    %cst_73 = arith.constant 0.000000e+00 : f32
    %125 = vector.shape_cast %23 : vector<1x256xi1> to vector<1x256xi1>
    %126 = vector.broadcast %125 : vector<1x256xi1> to vector<24x256xi1>
    %127 = vector.broadcast %cst_73 : f32 to vector<24x256xf32>
    %128 = arith.select %126, %124, %127 : vector<24x256xi1>, vector<24x256xf32>
    %c144 = arith.constant 144 : index
    %c0_74 = arith.constant 0 : index
    %129 = vector.load %arg10[%c144, %c0_74] : memref<216x256xf32, #tpu.memory_space<vmem>>, vector<24x256xf32>
    tpu.vector_store %arg10[%c144, %c0_74], %128 {strides = array<i32>} : memref<216x256xf32, #tpu.memory_space<vmem>>, vector<24x256xf32>,
    %c240_i32_75 = arith.constant 240 : i32
    %130 = tpu.dynamic_rotate %92 by %c240_i32_75 dim 1 : vector<24x256xf32>, i32 -> vector<24x256xf32>
    %cst_76 = arith.constant 0.000000e+00 : f32
    %131 = vector.shape_cast %27 : vector<1x256xi1> to vector<1x256xi1>
    %132 = vector.broadcast %131 : vector<1x256xi1> to vector<24x256xi1>
    %133 = vector.broadcast %cst_76 : f32 to vector<24x256xf32>
    %134 = arith.select %132, %130, %133 : vector<24x256xi1>, vector<24x256xf32>
    %c168 = arith.constant 168 : index
    %c0_77 = arith.constant 0 : index
    %135 = vector.load %arg10[%c168, %c0_77] : memref<216x256xf32, #tpu.memory_space<vmem>>, vector<24x256xf32>
    tpu.vector_store %arg10[%c168, %c0_77], %134 {strides = array<i32>} : memref<216x256xf32, #tpu.memory_space<vmem>>, vector<24x256xf32>,
    %c239_i32_78 = arith.constant 239 : i32
    %136 = tpu.dynamic_rotate %92 by %c239_i32_78 dim 1 : vector<24x256xf32>, i32 -> vector<24x256xf32>
    %cst_79 = arith.constant 0.000000e+00 : f32
    %137 = vector.shape_cast %31 : vector<1x256xi1> to vector<1x256xi1>
    %138 = vector.broadcast %137 : vector<1x256xi1> to vector<24x256xi1>
    %139 = vector.broadcast %cst_79 : f32 to vector<24x256xf32>
    %140 = arith.select %138, %136, %139 : vector<24x256xi1>, vector<24x256xf32>
    %c192 = arith.constant 192 : index
    %c0_80 = arith.constant 0 : index
    %141 = vector.load %arg10[%c192, %c0_80] : memref<216x256xf32, #tpu.memory_space<vmem>>, vector<24x256xf32>
    tpu.vector_store %arg10[%c192, %c0_80], %140 {strides = array<i32>} : memref<216x256xf32, #tpu.memory_space<vmem>>, vector<24x256xf32>,
    %c0_81 = arith.constant 0 : index
    %c0_82 = arith.constant 0 : index
    %142 = vector.load %arg5[%c0_81, %c0_82] : memref<16x216xf32, #tpu.memory_space<vmem>>, vector<16x216xf32>
    %c0_83 = arith.constant 0 : index
    %c0_84 = arith.constant 0 : index
    %143 = vector.load %arg10[%c0_83, %c0_84] : memref<216x256xf32, #tpu.memory_space<vmem>>, vector<216x256xf32>
    %cst_85 = arith.constant dense<0.000000e+00> : vector<16x256xf32>
    %144 = tpu.matmul %142, %143, %cst_85 {dimension_numbers = #tpu.dot_dimension_numbers<[1], [0], [0], [1], [0, 0, 1, 1], [], []>} : vector<16x216xf32>, vector<216x256xf32>, vector<16x256xf32> -> vector<16x256xf32>
    %c0_86 = arith.constant 0 : index
    %c0_87 = arith.constant 0 : index
    %145 = vector.load %arg6[%c0_86, %c0_87] : memref<16x1xf32, #tpu.memory_space<vmem>>, vector<16x1xf32>
    %146 = vector.broadcast %145 : vector<16x1xf32> to vector<16x256xf32>
    %147 = arith.addf %144, %146 : vector<16x256xf32>
    %cst_88 = arith.constant 0.000000e+00 : f32
    %148 = vector.broadcast %cst_88 : f32 to vector<16x256xf32>
    %149 = arith.cmpf ogt, %147, %148 : vector<16x256xf32>
    %cst_89 = arith.constant 1.000000e-03 : f32
    %150 = vector.broadcast %cst_89 : f32 to vector<16x256xf32>
    %151 = arith.mulf %150, %147 : vector<16x256xf32>
    %152 = arith.select %149, %147, %151 : vector<16x256xi1>, vector<16x256xf32>
    %c17_i32_90 = arith.constant 17 : i32
    %153 = tpu.dynamic_rotate %152 by %c17_i32_90 dim 1 : vector<16x256xf32>, i32 -> vector<16x256xf32>
    %cst_91 = arith.constant 0.000000e+00 : f32
    %154 = vector.shape_cast %3 : vector<1x256xi1> to vector<1x256xi1>
    %155 = vector.broadcast %154 : vector<1x256xi1> to vector<16x256xi1>
    %156 = vector.broadcast %cst_91 : f32 to vector<16x256xf32>
    %157 = arith.select %155, %153, %156 : vector<16x256xi1>, vector<16x256xf32>
    %c0_92 = arith.constant 0 : index
    %c0_93 = arith.constant 0 : index
    %158 = vector.load %arg10[%c0_92, %c0_93] : memref<216x256xf32, #tpu.memory_space<vmem>>, vector<16x256xf32>
    tpu.vector_store %arg10[%c0_92, %c0_93], %157 {strides = array<i32>} : memref<216x256xf32, #tpu.memory_space<vmem>>, vector<16x256xf32>,
    %c16_i32_94 = arith.constant 16 : i32
    %159 = tpu.dynamic_rotate %152 by %c16_i32_94 dim 1 : vector<16x256xf32>, i32 -> vector<16x256xf32>
    %cst_95 = arith.constant 0.000000e+00 : f32
    %160 = vector.shape_cast %7 : vector<1x256xi1> to vector<1x256xi1>
    %161 = vector.broadcast %160 : vector<1x256xi1> to vector<16x256xi1>
    %162 = vector.broadcast %cst_95 : f32 to vector<16x256xf32>
    %163 = arith.select %161, %159, %162 : vector<16x256xi1>, vector<16x256xf32>
    %c16_96 = arith.constant 16 : index
    %c0_97 = arith.constant 0 : index
    %164 = vector.load %arg10[%c16_96, %c0_97] : memref<216x256xf32, #tpu.memory_space<vmem>>, vector<16x256xf32>
    tpu.vector_store %arg10[%c16_96, %c0_97], %163 {strides = array<i32>} : memref<216x256xf32, #tpu.memory_space<vmem>>, vector<16x256xf32>,
    %c15_i32_98 = arith.constant 15 : i32
    %165 = tpu.dynamic_rotate %152 by %c15_i32_98 dim 1 : vector<16x256xf32>, i32 -> vector<16x256xf32>
    %cst_99 = arith.constant 0.000000e+00 : f32
    %166 = vector.shape_cast %11 : vector<1x256xi1> to vector<1x256xi1>
    %167 = vector.broadcast %166 : vector<1x256xi1> to vector<16x256xi1>
    %168 = vector.broadcast %cst_99 : f32 to vector<16x256xf32>
    %169 = arith.select %167, %165, %168 : vector<16x256xi1>, vector<16x256xf32>
    %c32_100 = arith.constant 32 : index
    %c0_101 = arith.constant 0 : index
    %170 = vector.load %arg10[%c32_100, %c0_101] : memref<216x256xf32, #tpu.memory_space<vmem>>, vector<16x256xf32>
    tpu.vector_store %arg10[%c32_100, %c0_101], %169 {strides = array<i32>} : memref<216x256xf32, #tpu.memory_space<vmem>>, vector<16x256xf32>,
    %c1_i32_102 = arith.constant 1 : i32
    %171 = tpu.dynamic_rotate %152 by %c1_i32_102 dim 1 : vector<16x256xf32>, i32 -> vector<16x256xf32>
    %cst_103 = arith.constant 0.000000e+00 : f32
    %172 = vector.shape_cast %15 : vector<1x256xi1> to vector<1x256xi1>
    %173 = vector.broadcast %172 : vector<1x256xi1> to vector<16x256xi1>
    %174 = vector.broadcast %cst_103 : f32 to vector<16x256xf32>
    %175 = arith.select %173, %171, %174 : vector<16x256xi1>, vector<16x256xf32>
    %c48_104 = arith.constant 48 : index
    %c0_105 = arith.constant 0 : index
    %176 = vector.load %arg10[%c48_104, %c0_105] : memref<216x256xf32, #tpu.memory_space<vmem>>, vector<16x256xf32>
    tpu.vector_store %arg10[%c48_104, %c0_105], %175 {strides = array<i32>} : memref<216x256xf32, #tpu.memory_space<vmem>>, vector<16x256xf32>,
    %c64_106 = arith.constant 64 : index
    %c0_107 = arith.constant 0 : index
    %177 = vector.load %arg10[%c64_106, %c0_107] : memref<216x256xf32, #tpu.memory_space<vmem>>, vector<16x256xf32>
    tpu.vector_store %arg10[%c64_106, %c0_107], %152 {strides = array<i32>} : memref<216x256xf32, #tpu.memory_space<vmem>>, vector<16x256xf32>,
    %c255_i32_108 = arith.constant 255 : i32
    %178 = tpu.dynamic_rotate %152 by %c255_i32_108 dim 1 : vector<16x256xf32>, i32 -> vector<16x256xf32>
    %cst_109 = arith.constant 0.000000e+00 : f32
    %179 = vector.shape_cast %19 : vector<1x256xi1> to vector<1x256xi1>
    %180 = vector.broadcast %179 : vector<1x256xi1> to vector<16x256xi1>
    %181 = vector.broadcast %cst_109 : f32 to vector<16x256xf32>
    %182 = arith.select %180, %178, %181 : vector<16x256xi1>, vector<16x256xf32>
    %c80 = arith.constant 80 : index
    %c0_110 = arith.constant 0 : index
    %183 = vector.load %arg10[%c80, %c0_110] : memref<216x256xf32, #tpu.memory_space<vmem>>, vector<16x256xf32>
    tpu.vector_store %arg10[%c80, %c0_110], %182 {strides = array<i32>} : memref<216x256xf32, #tpu.memory_space<vmem>>, vector<16x256xf32>,
    %c241_i32_111 = arith.constant 241 : i32
    %184 = tpu.dynamic_rotate %152 by %c241_i32_111 dim 1 : vector<16x256xf32>, i32 -> vector<16x256xf32>
    %cst_112 = arith.constant 0.000000e+00 : f32
    %185 = vector.shape_cast %23 : vector<1x256xi1> to vector<1x256xi1>
    %186 = vector.broadcast %185 : vector<1x256xi1> to vector<16x256xi1>
    %187 = vector.broadcast %cst_112 : f32 to vector<16x256xf32>
    %188 = arith.select %186, %184, %187 : vector<16x256xi1>, vector<16x256xf32>
    %c96_113 = arith.constant 96 : index
    %c0_114 = arith.constant 0 : index
    %189 = vector.load %arg10[%c96_113, %c0_114] : memref<216x256xf32, #tpu.memory_space<vmem>>, vector<16x256xf32>
    tpu.vector_store %arg10[%c96_113, %c0_114], %188 {strides = array<i32>} : memref<216x256xf32, #tpu.memory_space<vmem>>, vector<16x256xf32>,
    %c240_i32_115 = arith.constant 240 : i32
    %190 = tpu.dynamic_rotate %152 by %c240_i32_115 dim 1 : vector<16x256xf32>, i32 -> vector<16x256xf32>
    %cst_116 = arith.constant 0.000000e+00 : f32
    %191 = vector.shape_cast %27 : vector<1x256xi1> to vector<1x256xi1>
    %192 = vector.broadcast %191 : vector<1x256xi1> to vector<16x256xi1>
    %193 = vector.broadcast %cst_116 : f32 to vector<16x256xf32>
    %194 = arith.select %192, %190, %193 : vector<16x256xi1>, vector<16x256xf32>
    %c112 = arith.constant 112 : index
    %c0_117 = arith.constant 0 : index
    %195 = vector.load %arg10[%c112, %c0_117] : memref<216x256xf32, #tpu.memory_space<vmem>>, vector<16x256xf32>
    tpu.vector_store %arg10[%c112, %c0_117], %194 {strides = array<i32>} : memref<216x256xf32, #tpu.memory_space<vmem>>, vector<16x256xf32>,
    %c239_i32_118 = arith.constant 239 : i32
    %196 = tpu.dynamic_rotate %152 by %c239_i32_118 dim 1 : vector<16x256xf32>, i32 -> vector<16x256xf32>
    %cst_119 = arith.constant 0.000000e+00 : f32
    %197 = vector.shape_cast %31 : vector<1x256xi1> to vector<1x256xi1>
    %198 = vector.broadcast %197 : vector<1x256xi1> to vector<16x256xi1>
    %199 = vector.broadcast %cst_119 : f32 to vector<16x256xf32>
    %200 = arith.select %198, %196, %199 : vector<16x256xi1>, vector<16x256xf32>
    %c128 = arith.constant 128 : index
    %c0_120 = arith.constant 0 : index
    %201 = vector.load %arg10[%c128, %c0_120] : memref<216x256xf32, #tpu.memory_space<vmem>>, vector<16x256xf32>
    tpu.vector_store %arg10[%c128, %c0_120], %200 {strides = array<i32>} : memref<216x256xf32, #tpu.memory_space<vmem>>, vector<16x256xf32>,
    %c0_121 = arith.constant 0 : index
    %c0_122 = arith.constant 0 : index
    %202 = vector.load %arg7[%c0_121, %c0_122] : memref<8x144xf32, #tpu.memory_space<vmem>>, vector<8x144xf32>
    %c0_123 = arith.constant 0 : index
    %c0_124 = arith.constant 0 : index
    %203 = vector.load %arg10[%c0_123, %c0_124] : memref<216x256xf32, #tpu.memory_space<vmem>>, vector<144x256xf32>
    %cst_125 = arith.constant dense<0.000000e+00> : vector<8x256xf32>
    %204 = tpu.matmul %202, %203, %cst_125 {dimension_numbers = #tpu.dot_dimension_numbers<[1], [0], [0], [1], [0, 0, 1, 1], [], []>} : vector<8x144xf32>, vector<144x256xf32>, vector<8x256xf32> -> vector<8x256xf32>
    %c0_126 = arith.constant 0 : index
    %c0_127 = arith.constant 0 : index
    %205 = vector.load %arg8[%c0_126, %c0_127] : memref<8x1xf32, #tpu.memory_space<vmem>>, vector<8x1xf32>
    %206 = vector.broadcast %205 : vector<8x1xf32> to vector<8x256xf32>
    %207 = arith.addf %204, %206 : vector<8x256xf32>
    %c0_128 = arith.constant 0 : index
    %c0_129 = arith.constant 0 : index
    %208 = vector.load %arg9[%c0_128, %c0_129] : memref<8x256xf32, #tpu.memory_space<vmem>>, vector<8x256xf32>
    tpu.vector_store %arg9[%c0_128, %c0_129], %207 {strides = array<i32>} : memref<8x256xf32, #tpu.memory_space<vmem>>, vector<8x256xf32>,
    return
  }
  func.func @transform_0(%arg0: i32) -> (i32, i32) {
    %c0_i32 = arith.constant 0 : i32
    %c0_i32_0 = arith.constant 0 : i32
    return %c0_i32, %arg0 : i32, i32
  }
  func.func @transform_1(%arg0: i32) -> (i32, i32, i32) {
    %c0_i32 = arith.constant 0 : i32
    %c0_i32_0 = arith.constant 0 : i32
    %c0_i32_1 = arith.constant 0 : i32
    %c0_i32_2 = arith.constant 0 : i32
    return %c0_i32, %c0_i32_0, %c0_i32_1 : i32, i32, i32
  }
  func.func @transform_2(%arg0: i32) -> (i32, i32) {
    %c0_i32 = arith.constant 0 : i32
    %c0_i32_0 = arith.constant 0 : i32
    %c0_i32_1 = arith.constant 0 : i32
    return %c0_i32, %c0_i32_0 : i32, i32
  }
  func.func @transform_3(%arg0: i32) -> (i32, i32) {
    %c0_i32 = arith.constant 0 : i32
    %c0_i32_0 = arith.constant 0 : i32
    %c0_i32_1 = arith.constant 0 : i32
    return %c0_i32, %c0_i32_0 : i32, i32
  }
  func.func @transform_4(%arg0: i32) -> (i32, i32) {
    %c0_i32 = arith.constant 0 : i32
    %c0_i32_0 = arith.constant 0 : i32
    %c0_i32_1 = arith.constant 0 : i32
    return %c0_i32, %c0_i32_0 : i32, i32
  }
  func.func @transform_5(%arg0: i32) -> (i32, i32) {
    %c0_i32 = arith.constant 0 : i32
    %c0_i32_0 = arith.constant 0 : i32
    %c0_i32_1 = arith.constant 0 : i32
    return %c0_i32, %c0_i32_0 : i32, i32
  }
  func.func @transform_6(%arg0: i32) -> (i32, i32) {
    %c0_i32 = arith.constant 0 : i32
    %c0_i32_0 = arith.constant 0 : i32
    %c0_i32_1 = arith.constant 0 : i32
    return %c0_i32, %c0_i32_0 : i32, i32
  }
  func.func @transform_7(%arg0: i32) -> (i32, i32) {
    %c0_i32 = arith.constant 0 : i32
    %c0_i32_0 = arith.constant 0 : i32
    %c0_i32_1 = arith.constant 0 : i32
    return %c0_i32, %c0_i32_0 : i32, i32
  }
  func.func @transform_8(%arg0: i32) -> (i32, i32) {
    %c0_i32 = arith.constant 0 : i32
    %c0_i32_0 = arith.constant 0 : i32
    return %c0_i32, %arg0 : i32, i32
  }
}

</mosaic_0001>

<bundles_post_ra>
// kernel: tpu_custom_call.1
= control target key start
LH: loop header
LB: loop body
LE: loop exit
PB: predicated region body
PF: predicated region fallthrough
CT: control target
= control target key end

     0   :  { %s3285_s0 = inlined_call_operand.vmem [shape: f32[8,512], index: 0, kind: input, shape index: {}]   ;;  %s3286_s1 = inlined_call_operand.hbm [shape: f32[9,1,256], index: 1, kind: input, shape index: {}]   ;;  %s3287_s2 = inlined_call_operand.hbm [shape: f32[24,72], index: 2, kind: input, shape index: {}]   ;;  %s3288_s3 = inlined_call_operand.vmem [shape: f32[24,1], index: 3, kind: input, shape index: {}]   ;;  %s3289_s4 = inlined_call_operand.vmem [shape: f32[16,216], index: 4, kind: input, shape index: {}]   ;;  %s3290_s5 = inlined_call_operand.vmem [shape: f32[16,1], index: 5, kind: input, shape index: {}]   ;;  %s3291_s6 = inlined_call_operand.hbm [shape: f32[8,144], index: 6, kind: input, shape index: {}]   ;;  %s3292_s7 = inlined_call_operand.vmem [shape: f32[8,1], index: 7, kind: input, shape index: {}]   ;;  %s3293_s8 = inlined_call_operand.hbm [shape: f32[8,512], index: 8, kind: output, shape index: {}]  }
   0x1   :  { %3352 = sst [smem:[#allocation16_spill]] %s3287_s2 }
   0x2   :  { %13 = vsyncpa [#allocation4], 0 }
   0x3   :  { %14 = vsyncpa [#allocation7], 0 }
   0x4   :  { %15 = vsyncpa [#allocation5], 0 }
   0x5   :  { %17 = vsyncpa [#allocation5 + $0x1], 0  ;;  %s2316_s27 = smov 0   ;;  %s2318_s28 = smov 0  }
   0x6   :  { %s2320_s29 = smov 0   ;;  %s2322_s30 = smov 0  }
   0x7 LB: > { %3353 = sst [smem:[#allocation13_spill]] %s2246_s29  ;;  %s2337_s9 = sadd.s32 4294967295, %s2250_s30   ;;  %s2250_s30 = sphi %s2322_s30, %s3520_s30   ;;  %s2246_s29 = sphi %s2320_s29, %s3522_s29   ;;  %s2242_s28 = sphi %s2318_s28, %s3524_s28   ;;  %s2238_s27 = sphi %s2316_s27, %s3523_s27  }
   0x8   : > { %s1506_s10 = sadd.s32 4294967294, %s2250_s30   ;;  %s2341_s11 = sadd.s32 1, %s2250_s30  }
   0x9   : > { %3354 = sst [smem:[#allocation14_spill]] %s2341_s11  ;;  %s203_s12 = sadd.s32 1, %s2246_s29 }
   0xa   : > { %s200_s13 = ssub.s32 %s2250_s30, %s2341_s11  ;;  %p213_p0 = scmp.ne.s32.totalorder %s2246_s29, %s2242_s28 }
   0xb   : > { %p201_p1 = scmp.eq.s32.totalorder %s200_s13, 0  ;;  %p214_p2 = scmp.eq.s32.totalorder %s2337_s9, 1 }
   0xc   : > { %p219_p3 = scmp.ne.s32.totalorder %s2242_s28, %s2238_s27  ;;  %p220_p4 = scmp.eq.s32.totalorder %s1506_s10, 1 }
   0xd   : > { %s2352_s14 = scalar_select %p201_p1, %s2246_s29, %s203_s12  }
   0xe   : > { %p2354_p5 = por %p214_p2, %p213_p0  ;;  %p2358_p6 = por %p220_p4, %p219_p3 }
   0xf   : > { %3355 = sst [smem:[#allocation15_spill]] %s2352_s14  ;;  %p1507_p7 = scmp.ge.s32.totalorder %s2250_s30, 1 }
  0x10   : > { %s3356_s15 = scalar_select %p2354_p5, 1, 0 }
  0x11   : > { %s3357_s16 = scalar_select %p2358_p6, 1, 0 }
  0x12   : > { %p227_p8 = scmp.lt.s32.totalorder %s2250_s30, 3  ;;  %p3294_p9 = scmp.eq.s32.totalorder %s2337_s9, 0 }
  0x13   : > { %s2252_s18 = smov [#allocation6]   ;;  %s2253_s21 = smov [#allocation3]  }
  0x14   : > { %p2365_p10 = pnand %p1507_p7, %p227_p8  ;;  %s252_s19 = sshll.u32 %s2252_s18, 4  ;;  %s253_s19 = int_to_ptr.vmem [resolvable:$true] %s252_s19 }
  0x15   : > { %s239_s22 = sshll.u32 %s2253_s21, 4  ;;  %s3360_s2 = sld [smem:[#allocation16_spill]]  ;;  %s2377_s22 = int_to_ptr.vmem [resolvable:$true] %s239_s22 }
  0x16   : > { %s3358_s17 = scalar_select %p2365_p10, 1, 0 }
  0x17   : > { %p1793_p11 = pneg %p2365_p10 }
  0x19   : > { %p2373_p12 = pnand %p3294_p9, %p1793_p11 }
  0x1b   : > { %s2096_s25 = scalar_lea.hbm %s3360_s2, 384  ;;  %p2387_p0 = pneg %p2373_p12 }
  0x1c   : > { %p2097_p13 = scmp.ne.s32.totalorder %s3360_s2, %s2096_s25  ;;  %p2103_p3 = scmp.lt.u32.totalorder %s2096_s25, %s3360_s2 }
  0x1e   : > { %p2099_p1 = pnand %p2387_p0, %p2097_p13 }
  0x20   : > { %p2100_p2 = pneg %p2099_p1 }
  0x22   : > { %p2105_p4 = pnand %p2103_p3, %p2100_p2 }
  0x24   : > { %2108 = shalt.err (!%p2105_p4)
}
  0x25   : > { %s2109_s21 = scalar_lea.vmem %s253_s19, 384  ;;  %p2117_p9 = scmp.lt.s32.totalorder %s253_s19, %s253_s19 }
  0x26   : > { %p2110_p7 = scmp.ne.s32.totalorder %s253_s19, %s2109_s21  ;;  %p2118_p6 = scmp.lt.s32.totalorder %s2109_s21, %s2109_s21 }
  0x28   : > { %p2112_p8 = pnand %p2110_p7, %p2387_p0  ;;  %p2119_p5 = por %p2118_p6, %p2117_p9 }
  0x2a   : > { %p2113_p11 = pneg %p2112_p8 }
  0x2c   : > { %p2120_p10 = pnand %p2119_p5, %p2113_p11 }
  0x2e   : > { %2123 = shalt.err (!%p2120_p10)
}
  0x2f   : > { %s2254_s23 = smov 128   ;;  %s2255_s24 = smov 8  }
  0x30   : > { %1799 = dma.hbm_to_vmem [thread:$0]  (!%p2373_p12), %s3360_s2, 384, %s253_s19, [#allocation7], %s2254_s23, %s2254_s23, %s2255_s24  }
  0x31   : > { %s2124_s18 = scalar_lea.hbm %s3286_s1, 288 }
  0x32   : > { %p2125_p13 = scmp.ne.s32.totalorder %s3286_s1, %s2124_s18  ;;  %p2131_p9 = scmp.lt.u32.totalorder %s2124_s18, %s3286_s1 }
  0x34   : > { %p2127_p5 = pnand %p2125_p13, %p2387_p0 }
  0x36   : > { %p2128_p6 = pneg %p2127_p5 }
  0x38   : > { %p2133_p10 = pnand %p2131_p9, %p2128_p6 }
  0x3a   : > { %2136 = shalt.err (!%p2133_p10)
}
  0x3b   : > { %s2137_s19 = scalar_lea.vmem %s2377_s22, 288  ;;  %p2145_p4 = scmp.lt.s32.totalorder %s2377_s22, %s2377_s22 }
  0x3c   : > { %p2138_p1 = scmp.ne.s32.totalorder %s2377_s22, %s2137_s19  ;;  %p2146_p7 = scmp.lt.s32.totalorder %s2137_s19, %s2137_s19 }
  0x3e   : > { %p2140_p2 = pnand %p2138_p1, %p2387_p0  ;;  %p2147_p8 = por %p2146_p7, %p2145_p4 }
  0x40   : > { %p2141_p3 = pneg %p2140_p2 }
  0x42   : > { %p2148_p11 = pnand %p2147_p8, %p2141_p3 }
  0x44   : > { %2151 = shalt.err (!%p2148_p11)
}
  0x45   : > { %s2256_s29 = smov 32   ;;  %s2257_s11 = smov 2  }
  0x46   : > { %1796 = dma.hbm_to_vmem [thread:$0]  (!%p2373_p12), %s3286_s1, 288, %s2377_s22, [#allocation4], %s2256_s29, %s2256_s29, %s2257_s11  }
  0x47   : > { %s2258_s24 = smov [#allocation8]   ;;  %s2152_s13 = scalar_lea.hbm %s3291_s6, 256 }
  0x48   : > { %s275_s26 = sshll.u32 %s2258_s24, 4  ;;  %p2153_p13 = scmp.ne.s32.totalorder %s3291_s6, %s2152_s13  ;;  %s276_s26 = int_to_ptr.vmem [resolvable:$true] %s275_s26 }
  0x49   : > { %p2159_p9 = scmp.lt.u32.totalorder %s2152_s13, %s3291_s6 }
  0x4a   : > { %p2155_p5 = pnand %p2153_p13, %p2387_p0 }
  0x4c   : > { %p2156_p6 = pneg %p2155_p5 }
  0x4e   : > { %p2161_p10 = pnand %p2159_p9, %p2156_p6 }
  0x50   : > { %2164 = shalt.err (!%p2161_p10)
}
  0x51   : > { %s2165_s22 = scalar_lea.vmem %s276_s26, 256  ;;  %p2173_p4 = scmp.lt.s32.totalorder %s276_s26, %s276_s26 }
  0x52   : > { %p2166_p1 = scmp.ne.s32.totalorder %s276_s26, %s2165_s22  ;;  %p2174_p7 = scmp.lt.s32.totalorder %s2165_s22, %s2165_s22 }
  0x54   : > { %p2168_p2 = pnand %p2166_p1, %p2387_p0  ;;  %p2175_p8 = por %p2174_p7, %p2173_p4 }
  0x56   : > { %p2169_p3 = pneg %p2168_p2 }
  0x58   : > { %p2176_p11 = pnand %p2175_p8, %p2169_p3 }
  0x5a   : > { %2179 = shalt.err (!%p2176_p11)
}
  0x5b   : > { %1802 = dma.hbm_to_vmem [thread:$0]  (!%p2373_p12), %s3291_s6, 256, %s276_s26, [#allocation7]  }
  0x5c   : > { %p3362_p13 = scmp.ne.s32.totalorder %s3358_s17, 0 }
  0x5d   : > { %p3363_p5 = scmp.eq.s32.totalorder (!%p3362_p13), %s2337_s9, 0 }
  0x5e   : > { %300 = sbr.rel (%p3362_p13) target bundleno = 1271 (0x4f7), region = 52 }
  0x65   : > { %2225 = dma.done.wait (%p3363_p5), [#allocation4], 288   ;;  %p3364_p0 = pmov %p3363_p5 }
  0x67   : > { %2227 = vsyncadd (%p3364_p0), [#allocation4], 4294967008  ;;  %p3365_p6 = pmov %p3364_p0 }
  0x68   : > { %p3366_p9 = pmov %p3364_p0 }
  0x69   : > { %2229 = dma.done.wait (%p3365_p6), [#allocation7], 640  }
  0x6a   : > { %2231 = vsyncadd (%p3366_p9), [#allocation7], 4294966656  ;;  %s1517_s2 = sshll.u32 %s2337_s9, 1  ;;  %v2259_v0 = vmov 0   ;;  %s2260_s23 = smov 15   ;;  %v2268_v4 = vmov 0.0   ;;  %v378_v8 = vlaneseq }
  0x6b   : > { %p343_p10 = scmp.lt.s32.totalorder %s1517_s2, 3  ;;  %1899 = vset.pattern.permute.xlu1 %v2259_v0  ;;  %1900 = vset.pattern.permute.xlu0 %v2259_v0  ;;  %s2261_s24 = smov 17   ;;  %v575_v5 = vld [vmem:[%s3288_s3] sm:$0xff]  ;;  %v576_v6 = vld [vmem:[%s3288_s3 + $0x8] sm:$0xff]  ;;  %v577_v7 = vld [vmem:[%s3288_s3 + $0x10] sm:$0xff]  ;;  %v3369_v34 = vmov 0 }
  0x6c   : > { %s2262_s26 = smov 1   ;;  %s2263_s25 = smov 16   ;;  %667 = vmatprep.mubr.f32.mxu0 %v2268_v4  ;;  %v349_v9 = vld [vmem:[#allocation3] sm:$0x3]  ;;  %v352_v10 = vld [vmem:[#allocation3 + $0x2] sm:$0x3] }
  0x6d   : > { %s3526_s2 = smov (!%p343_p10, %s1517_s2), 3  ;;  %s2264_s10 = smov 127   ;;  %v385_v11 = vshrl.u32 %v378_v8, 7  ;;  %v355_v12 = vld [vmem:[#allocation3 + $0x4] sm:$0x3]  ;;  %vm350_vm0 = vcmp.gt.f32.partialorder %v349_v9, 0.0 }
  0x6e   : > { %s1518_s17 = sshll.u32 %s3526_s2, 3  ;;  %s2265_s13 = smov 113   ;;  %vm353_vm1 = vcmp.gt.f32.partialorder %v352_v10, 0.0  ;;  %v358_v13 = vld [vmem:[#allocation3 + $0x6] sm:$0x3]  ;;  %vm356_vm2 = vcmp.gt.f32.partialorder %v355_v12, 0.0 }
  0x6f   : > { %s346_s14 = scalar_lea.vmem %s3285_s0, %s1518_s17  ;;  %s2266_s18 = smov 112   ;;  %v2487_v14 = vsub.s32 1, %v385_v11  ;;  %v383_v15 = vsel %vm350_vm0, 1, %v2259_v0  ;;  %v2490_v16 = vsub.s32 0, %v385_v11  ;;  %v405_v17 = vsel %vm353_vm1, 1, %v2259_v0 }
  0x70   : > { %v2460_v1 = vld [vmem:[%s346_s14] sm:$0xff]  ;;  %v2462_v2 = vld [vmem:[%s346_s14 + $0x8] sm:$0xff]  ;;  %s2267_s21 = smov 111   ;;  %vm359_vm3 = vcmp.gt.f32.partialorder %v358_v13, 0.0  ;;  %v2493_v18 = vand.u32 127, %v378_v8  ;;  %v427_v19 = vsel %vm356_vm2, 1, %v2259_v0 }
  0x71   : > { %v1874_v3 = vpack.i.bf16 %v2462_v2, %v2460_v1  ;;  %v391_v20 = vrot.slane %v383_v15, %v2487_v14  ;;  %v413_v21 = vrot.slane %v405_v17, %v2487_v14  ;;  %v387_v22 = vrot.slane %v383_v15, %v2490_v16  ;;  %v361_v26 = vld [vmem:[#allocation3 + $0xa] sm:$0x3]  ;;  %v364_v27 = vld [vmem:[#allocation3 + $0xc] sm:$0x3]  ;;  %v367_v28 = vld [vmem:[#allocation3 + $0xe] sm:$0x3] }
  0x72   : > { %v449_v23 = vsel %vm359_vm3, 1, %v2259_v0  ;;  %vm3301_vm4 = vcmp.lt.s32.totalorder %v2493_v18, 15  ;;  %v409_v24 = vrot.slane %v405_v17, %v2490_v16  ;;  %v435_v25 = vrot.slane %v427_v19, %v2487_v14  ;;  %v370_v9 = vld [vmem:[#allocation3 + $0x10] sm:$0x3]  ;;  %p3518_p1 = scmp.ne.s32.totalorder %s3356_s15, 0  ;;  %s2270_s11 = smov [#allocation9]  }
  0x73   : > { %1875 = vrot.lane.b32.xlu1 %v1874_v3, %s2260_s23  ;;  %1865 = vrot.lane.b32.xlu0 %v1874_v3, %s2261_s24  ;;  %vm3302_vm5 = vcmp.lt.s32.totalorder %v2493_v18, 1  ;;  %vm3303_vm6 = vcmp.lt.s32.totalorder %v2493_v18, 17  ;;  %vm2505_vm7 = vcmp.eq.s32.totalorder %v391_v20, 1  ;;  %vm3300_vm8 = vcmp.lt.s32.totalorder %v2493_v18, 16  ;;  %s2184_s2 = sshll.u32 %s2270_s11, 4  ;;  %s2185_s2 = int_to_ptr.vmem [resolvable:$false] %s2184_s2 }
  0x74   : > { %v457_v30 = vrot.slane %v449_v23, %v2487_v14  ;;  %v431_v31 = vrot.slane %v427_v19, %v2490_v16  ;;  %vm2512_vm9 = vcmp.eq.s32.totalorder %v413_v21, 1  ;;  %vm2516_vm10 = vcmp.eq.s32.totalorder %v387_v22, 1  ;;  %s2186_s17 = scalar_lea.vmem %s2185_s2, 512 }
  0x75   : > { %v3370_v34 = vsel %vm2512_vm9, 4294967295, %v3369_v34  ;;  %v453_v36 = vrot.slane %v449_v23, %v2490_v16  ;;  %vm362_vm12 = vcmp.gt.f32.partialorder %v361_v26, 0.0  ;;  %vm2522_vm13 = vcmp.eq.s32.totalorder %v409_v24, 1 }
  0x76   : > { %v3373_v37 = vmov 0  ;;  %vm2526_vm14 = vcmp.eq.s32.totalorder %v435_v25, 1  ;;  %v3375_v38 = vmov 0  ;;  %vm365_vm15 = vcmp.gt.f32.partialorder %v364_v27, 0.0 }
  0x77   : > { %1880 = vrot.lane.b32.xlu1 %v1874_v3, %s2262_s26  ;;  %1870 = vrot.lane.b32.xlu0 %v1874_v3, %s2263_s25  ;;  %v3374_v37 = vsel %vm2522_vm13, 4294967295, %v3373_v37  ;;  %v3376_v38 = vsel %vm2526_vm14, 4294967295, %v3375_v38  ;;  %vm368_vm0 = vcmp.gt.f32.partialorder %v367_v28, 0.0  ;;  %vm2530_vm1 = vcmp.eq.s32.totalorder %v457_v30, 1 }
  0x78   : > { %v3377_v43 = vmov 0  ;;  %vm2534_vm2 = vcmp.eq.s32.totalorder %v431_v31, 1  ;;  %vm3307_vm3 = vcmp.lt.s32.totalorder %v2493_v18, 113  ;;  %v473_v45 = vsel %vm362_vm12, 1, %v2259_v0  ;;  %vm3304_vm12 = vmpackc.low %vm2512_vm9, %vm2505_vm7 }
  0x79   : > { %v3378_v43 = vsel %vm2530_vm1, 4294967295, %v3377_v43  ;;  %vm2540_vm11 = vcmp.eq.s32.totalorder %v453_v36, 1  ;;  %v2545_v49 = vsel %vm365_vm15, 1, %v2259_v0  ;;  %v2548_v50 = vsel %vm368_vm0, 1, %v2259_v0  ;;  %vm3305_vm15 = vmpackc.low %vm2522_vm13, %vm2516_vm10 }
  0x7a   : > { %v481_v57 = vrot.slane %v473_v45, %v2487_v14  ;;  %v477_v58 = vrot.slane %v473_v45, %v2490_v16  ;;  %v525_v8 = vrot.slane %v2548_v50, %v2487_v14  ;;  %vm3306_vm0 = vmpackc.low %vm2530_vm1, %vm2526_vm14  ;;  %v3383_v20 = vmov 0 }
  0x7b   : > { %1885 = vrot.lane.b32.xlu0 %v1874_v3, %s2264_s10  ;;  %1890 = vrot.lane.b32.xlu1 %v1874_v3, %s2265_s13  ;;  %v499_v22 = vrot.slane %v2545_v49, %v2490_v16  ;;  %v3387_v26 = vmov 0  ;;  %v521_v27 = vrot.slane %v2548_v50, %v2490_v16  ;;  %v3393_v36 = vmov 0 }
  0x7c   : > { %vm3397_vm1 = vcmp.lt.s32.totalorder %v2493_v18, 113 }
  0x7f   : > { %1895 = vrot.lane.b32.xlu0 %v1874_v3, %s2266_s18  ;;  %532 = vrot.lane.b32.xlu1 %v2460_v1, %s2267_s21 }
  0x83   : > { %534 = vrot.lane.b32.xlu0 %v2462_v2, %s2267_s21  ;;  %580 = vperm.xlu1 %1899, %v575_v5  }
  0x87   : > { %585 = vperm.xlu0 %1900, %v576_v6   ;;  %590 = vperm.xlu1 %1899, %v577_v7   ;;  %v503_v7 = vrot.slane %v2545_v49, %v2487_v14 }
  0xe5   : > { %v1876_v32 = vpop.permute.xlu1 %1875  ;;  %v1866_v33 = vpop.permute.xlu0 %1865 }
  0xe6   : > { %v1878_v39 = vunpack.i.h.bf16 %v1876_v32  ;;  %v1877_v40 = vunpack.i.l.bf16 %v1876_v32  ;;  %v1868_v41 = vunpack.i.h.bf16 %v1866_v33  ;;  %v1867_v42 = vunpack.i.l.bf16 %v1866_v33 }
  0xe7   : > { %v3391_v33 = vmov 0 }
  0xe8   : > { %v425_v55 = vsel %vm3301_vm4, %v1877_v40, %v1878_v39  ;;  %v381_v56 = vsel %vm3303_vm6, %v1867_v42, %v1868_v41  ;;  %v382_v61 = vsel %vm3303_vm6, %v1868_v41, %v1867_v42  ;;  %v426_v15 = vsel %vm3301_vm4, %v1878_v39, %v1877_v40 }
  0xe9   : > { %v1881_v46 = vpop.permute.xlu1 %1880  ;;  %v1871_v47 = vpop.permute.xlu0 %1870  ;;  %vm3385_vm4 = vcmp.lt.s32.totalorder %v2493_v18, 127  ;;  %vm371_vm6 = vcmp.gt.f32.partialorder %v370_v9, 0.0 }
  0xea   : > { %v1883_v51 = vunpack.i.h.bf16 %v1881_v46  ;;  %v1882_v52 = vunpack.i.l.bf16 %v1881_v46  ;;  %v1873_v53 = vunpack.i.h.bf16 %v1871_v47  ;;  %v1872_v54 = vunpack.i.l.bf16 %v1871_v47 }
  0xeb   : > { %v539_v39 = vsel %vm371_vm6, 1, %v2259_v0  ;;  %v3403_v47 = vmov 0 }
  0xec   : > { %v447_v59 = vsel %vm3302_vm5, %v1882_v52, %v1883_v51  ;;  %v403_v60 = vsel %vm3300_vm8, %v1872_v54, %v1873_v53  ;;  %v404_v62 = vsel %vm3300_vm8, %v1873_v53, %v1872_v54  ;;  %v448_v17 = vsel %vm3302_vm5, %v1883_v51, %v1882_v52 }
  0xed   : > { %v1627_v63 = vpack.c.bf16 %v403_v60, %v381_v56  ;;  %v1630_v3 = vpack.c.bf16 %v404_v62, %v382_v61  ;;  %v1886_v5 = vpop.permute.xlu0 %1885  ;;  %v1891_v6 = vpop.permute.xlu1 %1890  ;;  %v1633_v19 = vpack.c.bf16 %v447_v59, %v425_v55  ;;  %vm2589_vm8 = vcmp.eq.s32.totalorder %v481_v57, 1  ;;  %v554_v56 = vld [vmem:[#allocation6] sm:$0xff]  ;;  %v555_v57 = vld [vmem:[#allocation6 + $0x8] sm:$0xff] }
  0xee   : > { %v1888_v10 = vunpack.i.h.bf16 %v1886_v5  ;;  %v1887_v11 = vunpack.i.l.bf16 %v1886_v5  ;;  %v1893_v12 = vunpack.i.h.bf16 %v1891_v6  ;;  %v1892_v13 = vunpack.i.l.bf16 %v1891_v6 }
  0xef   : > { %1629 = vmatprep.subr.msk.bf16.mxu0 %vm3304_vm12, %v1627_v63  ;;  %v3384_v20 = vsel %vm2589_vm8, 4294967295, %v3383_v20  ;;  %vm3386_vm12 = vmmov %vm3385_vm4  ;;  %vm2629_vm5 = vcmp.eq.s32.totalorder %v503_v7, 1  ;;  %v547_v49 = vrot.slane %v539_v39, %v2487_v14  ;;  %v543_v14 = vrot.slane %v539_v39, %v2490_v16 }
  0xf0   : > { %1632 = vmatpush1.bf16.msk.msra.mxu0 %vm3305_vm15, %v1630_v3  ;;  %v472_v21 = vsel %vm3385_vm4, %v1888_v10, %v1887_v11  ;;  %v471_v23 = vsel %vm3386_vm12, %v1887_v11, %v1888_v10  ;;  %vm2615_vm15 = vcmp.eq.s32.totalorder %v477_v58, 1  ;;  %v494_v28 = vsel %vm3307_vm3, %v1893_v12, %v1892_v13  ;;  %vm3395_vm3 = vmpackc.low %vm2540_vm11, %vm2534_vm2  ;;  %v556_v58 = vld [vmem:[#allocation6 + $0x10] sm:$0xff] }
  0xf1   : > { %v1639_v24 = vpack.c.bf16 %v472_v21, %v2462_v2  ;;  %1635 = vmatprep.subr.msk.bf16.mxu0 %vm3306_vm0, %v1633_v19  ;;  %v1896_v25 = vpop.permute.xlu0 %1895  ;;  %v3388_v26 = vsel %vm2615_vm15, 4294967295, %v3387_v26  ;;  %v1636_v2 = vpack.c.bf16 %v448_v17, %v426_v15  ;;  %vm2269_vm12 = vmmov 1   ;;  %v533_v50 = vpop.permute.xlu1 %532 }
  0xf2   : > { %v1898_v30 = vunpack.i.h.bf16 %v1896_v25  ;;  %v1897_v31 = vunpack.i.l.bf16 %v1896_v25  ;;  %vm2625_vm0 = vmpackc.low %vm2589_vm8, %vm2269_vm12  ;;  %v3392_v33 = vsel %vm2629_vm5, 4294967295, %v3391_v33  ;;  %vm2633_vm4 = vcmp.eq.s32.totalorder %v525_v8, 1 }
  0xf3   : > { %v3394_v36 = vsel %vm2633_vm4, 4294967295, %v3393_v36  ;;  %v1642_v40 = vpack.c.bf16 %v471_v23, %v2460_v1  ;;  %vm3396_vm8 = vcmp.lt.s32.totalorder %v2493_v18, 112  ;;  %v493_v42 = vsel %vm3397_vm1, %v1892_v13, %v1893_v12  ;;  %vm2655_vm6 = vmpackc.low %vm2615_vm15, %vm2269_vm12 }
  0xf4   : > { %1638 = vmatpush1.bf16.msk.msra.mxu0 %vm3395_vm3, %v1636_v2  ;;  %v516_v41 = vsel %vm3396_vm8, %v1898_v30, %v1897_v31  ;;  %vm3398_vm14 = vmmov %vm3396_vm8  ;;  %vm2663_vm3 = vcmp.eq.s32.totalorder %v499_v22, 1  ;;  %vm3320_vm1 = vcmp.lt.s32.totalorder %v2493_v18, 111  ;;  %vm2687_vm15 = vcmp.eq.s32.totalorder %v547_v49, 1  ;;  %v1008_v49 = vld [vmem:[%s3290_s5] sm:$0xff] }
  0xf5   : > { %v515_v45 = vsel %vm3398_vm14, %v1897_v31, %v1898_v30  ;;  %v1645_v46 = vpack.c.bf16 %v516_v41, %v494_v28  ;;  %1641 = vmatprep.subr.msk.bf16.mxu0 %vm2625_vm0, %v1639_v24  ;;  %vm3316_vm8 = vmpackc.low %vm2633_vm4, %vm2629_vm5  ;;  %vm2667_vm14 = vcmp.eq.s32.totalorder %v521_v27, 1  ;;  %v535_v51 = vpop.permute.xlu0 %534  ;;  %v3405_v54 = vmov 0 }
  0xf6   : > { %v3404_v47 = vsel %vm2667_vm14, 4294967295, %v3403_v47  ;;  %v1648_v52 = vpack.c.bf16 %v515_v45, %v493_v42  ;;  %vm3319_vm12 = vmpackc.low %vm2667_vm14, %vm2663_vm3  ;;  %v538_v53 = vsel %vm3320_vm1, %v535_v51, %v533_v50  ;;  %v3406_v54 = vsel %vm2687_vm15, 4294967295, %v3405_v54 }
  0xf7   : > { %v537_v55 = vsel %vm3320_vm1, %v533_v50, %v535_v51  ;;  %v3407_v16 = vmov 0  ;;  %vm593_vm4 = vcmask 588800   ;;  %v951_v50 = vld [vmem:[%s3289_s4 + $0x8] sm:$0xff]  ;;  %vm3416_vm14 = vmpackc.low %vm2516_vm10, %vm2516_vm10 }
  0xf8   : > { %1644 = vmatpush1.bf16.msk.msra.mxu0 %vm2655_vm6, %v1642_v40  ;;  %v1009_v51 = vld [vmem:[%s3290_s5 + $0x8] sm:$0xff] }
  0xf9   : > { %1647 = vmatprep.subr.msk.bf16.mxu0 %vm3316_vm8, %v1645_v46  ;;  %vm2700_vm8 = vcmp.eq.s32.totalorder %v543_v14, 1 }
  0xfa   : > { %v3408_v16 = vsel %vm2700_vm8, 4294967295, %v3407_v16 }
  0xfc   : > { %1650 = vmatpush1.bf16.msk.msra.mxu0 %vm3319_vm12, %v1648_v52 }
  0xfd   : > { %1545 = vmatprep.subr.msk.mxu0 %vm2687_vm15, %v538_v53 }
 0x100   : > { %1546 = vmatpush1.msk.msra.mxu0 %vm2700_vm8, %v537_v55 }
 0x101   : > { %1519 = vmatmul.mubr.msk.f32.vlgmr.msra.gmra.mrb[0].mxu0 %vm593_vm4, %v554_v56 }
 0x102   : > { %673 = vmatprep.mubr.f32.mxu0 %v2268_v4  ;;  %v581_v59 = vpop.permute.xlu1 %580 }
 0x105   : > { %1520 = vmatmul.mubr.msk.f32.gmra.mrb[2].mxu0 %vm593_vm4, %v555_v57 }
 0x106   : > { %679 = vmatprep.mubr.f32.mxu0 %v2268_v4  ;;  %v586_v3 = vpop.permute.xlu0 %585  ;;  %v591_v15 = vpop.permute.xlu1 %590 }
 0x109   : > { %1521 = vmatmul.mubr.msk.f32.gmra.mrb[4].mxu0 %vm593_vm4, %v556_v58 }
 0x1d4   : > { %v669_v60 = vpop.f32.mrb[0].mxu0 }
 0x1d5   : > { %v670_v61 = vadd.f32 %v669_v60, %v581_v59  ;;  %v671_v62 = vpop.f32.mrb[1].mxu0 }
 0x1d6   : > { %v672_v63 = vadd.f32 %v671_v62, %v581_v59 }
 0x1d7   : > { %vm686_vm12 = vcmp.gt.f32.partialorder %v670_v61, 0.0  ;;  %v692_v5 = vmul.f32 0.001, %v670_v61 }
 0x1d8   : > { %vm687_vm1 = vcmp.gt.f32.partialorder %v672_v63, 0.0  ;;  %v693_v6 = vmul.f32 0.001, %v672_v63  ;;  %v675_v7 = vpop.f32.mrb[2].mxu0 }
 0x1d9   : > { %v2708_v8 = vsel %vm686_vm12, %v670_v61, %v692_v5  ;;  %v676_v9 = vadd.f32 %v675_v7, %v586_v3  ;;  %v677_v10 = vpop.f32.mrb[3].mxu0 }
 0x1da   : > { %v2710_v11 = vsel %vm687_vm1, %v672_v63, %v693_v6  ;;  %v678_v4 = vadd.f32 %v677_v10, %v586_v3 }
 0x1db   : > { %vm688_vm8 = vcmp.gt.f32.partialorder %v676_v9, 0.0  ;;  %v694_v12 = vmul.f32 0.001, %v676_v9  ;;  %v1911_v13 = vpack.i.bf16 %v2710_v11, %v2708_v8 }
 0x1dc   : > { %vm689_vm4 = vcmp.gt.f32.partialorder %v678_v4, 0.0  ;;  %v695_v17 = vmul.f32 0.001, %v678_v4  ;;  %v681_v19 = vpop.f32.mrb[4].mxu0 }
 0x1dd   : > { %v2714_v21 = vsel %vm688_vm8, %v676_v9, %v694_v12  ;;  %v682_v22 = vadd.f32 %v681_v19, %v591_v15  ;;  %v683_v23 = vpop.f32.mrb[5].mxu0  ;;  %vm3323_vm8 = vcmask 719872  }
 0x1de   : > { %v2716_v24 = vsel %vm689_vm4, %v678_v4, %v695_v17  ;;  %v684_v25 = vadd.f32 %v683_v23, %v591_v15  ;;  %v1901_v27 = vpack.i.bf16 %v2714_v21, %v2708_v8  ;;  %v1689_v42 = vpack.c.bf16 %v2714_v21, %v2708_v8  ;;  %1522 = vmatprep.mubr.msk.f32.mxu1 %vm3323_vm8, %v951_v50 }
 0x1df   : > { %vm690_vm1 = vcmp.gt.f32.partialorder %v682_v22, 0.0  ;;  %v696_v2 = vmul.f32 0.001, %v682_v22  ;;  %v1906_v28 = vpack.i.bf16 %v2716_v24, %v2710_v11  ;;  %v1687_v39 = vpack.c.bf16 %v2716_v24, %v2710_v11 }
 0x1e0   : > { %vm691_vm12 = vcmp.gt.f32.partialorder %v684_v25, 0.0  ;;  %v697_v30 = vmul.f32 0.001, %v684_v25  ;;  %1902 = vrot.lane.b32.xlu1 %v1901_v27, %s2261_s24  ;;  %vm3409_vm4 = vcmp.lt.s32.totalorder %v2493_v18, 17 }
 0x1e1   : > { %v2723_v31 = vsel %vm690_vm1, %v682_v22, %v696_v2  ;;  %1907 = vrot.lane.b32.xlu0 %v1906_v28, %s2261_s24  ;;  %vm3410_vm1 = vmmov %vm3409_vm4 }
 0x1e2   : > { %v2728_v40 = vsel %vm691_vm12, %v684_v25, %v697_v30  ;;  %v1921_v46 = vpack.i.bf16 %v2723_v31, %v2714_v21  ;;  %vm3328_vm12 = vmpackc.low %vm2505_vm7, %vm2505_vm7 }
 0x1e3   : > { %v1916_v41 = vpack.i.bf16 %v2728_v40, %v2723_v31  ;;  %v1931_v45 = vpack.i.bf16 %v2728_v40, %v2716_v24  ;;  %vm3411_vm8 = vmmov %vm3410_vm1 }
 0x1e4   : > { %vm3412_vm15 = vmmov %vm3410_vm1 }
 0x1e5   : > { %1912 = vrot.lane.b32.xlu0 %v1911_v13, %s2263_s25  ;;  %1917 = vrot.lane.b32.xlu1 %v1916_v41, %s2261_s24 }
 0x1e9   : > { %1932 = vrot.lane.b32.xlu0 %v1931_v45, %s2263_s25  ;;  %1922 = vrot.lane.b32.xlu1 %v1921_v46, %s2263_s25 }
 0x1ed   : > { %1937 = vrot.lane.b32.xlu0 %v1906_v28, %s2260_s23  ;;  %1927 = vrot.lane.b32.xlu1 %v1901_v27, %s2260_s23 }
 0x1f1   : > { %1942 = vrot.lane.b32.xlu0 %v1911_v13, %s2262_s26  ;;  %1947 = vrot.lane.b32.xlu1 %v1916_v41, %s2260_s23 }
 0x1f5   : > { %1957 = vrot.lane.b32.xlu0 %v1931_v45, %s2262_s26  ;;  %1952 = vrot.lane.b32.xlu1 %v1921_v46, %s2262_s26 }
 0x1f9   : > { %1967 = vrot.lane.b32.xlu0 %v1921_v46, %s2264_s10  ;;  %1962 = vrot.lane.b32.xlu1 %v1911_v13, %s2264_s10 }
 0x1fd   : > { %1972 = vrot.lane.b32.xlu0 %v1901_v27, %s2265_s13  ;;  %1977 = vrot.lane.b32.xlu1 %v1931_v45, %s2264_s10 }
 0x201   : > { %1992 = vrot.lane.b32.xlu0 %v1916_v41, %s2265_s13  ;;  %1982 = vrot.lane.b32.xlu1 %v1906_v28, %s2265_s13 }
 0x205   : > { %1997 = vrot.lane.b32.xlu0 %v1921_v46, %s2266_s18  ;;  %1987 = vrot.lane.b32.xlu1 %v1911_v13, %s2266_s18 }
 0x209   : > { %2002 = vrot.lane.b32.xlu0 %v1901_v27, %s2267_s21  ;;  %2007 = vrot.lane.b32.xlu1 %v1931_v45, %s2266_s18 }
 0x20d   : > { %924 = vrot.lane.b32.xlu0 %v2723_v31, %s2267_s21  ;;  %2012 = vrot.lane.b32.xlu1 %v1906_v28, %s2267_s21 }
 0x211   : > { %1012 = vperm.xlu0 %1900, %v1008_v49   ;;  %930 = vrot.lane.b32.xlu1 %v2728_v40, %s2267_s21 }
 0x215   : > { %1017 = vperm.xlu1 %1899, %v1009_v51  }
 0x252   : > { %v1903_v52 = vpop.permute.xlu1 %1902 }
 0x253   : > { %v1905_v14 = vunpack.i.h.bf16 %v1903_v52  ;;  %v1904_v53 = vunpack.i.l.bf16 %v1903_v52  ;;  %v1908_v55 = vpop.permute.xlu0 %1907 }
 0x254   : > { %v1910_v56 = vunpack.i.h.bf16 %v1908_v55  ;;  %v1909_v57 = vunpack.i.l.bf16 %v1908_v55 }
 0x256   : > { %v716_v58 = vsel %vm3409_vm4, %v1904_v53, %v1909_v57  ;;  %v717_v59 = vsel %vm3410_vm1, %v1905_v14, %v1910_v56  ;;  %v719_v60 = vsel %vm3411_vm8, %v1909_v57, %v1904_v53  ;;  %v720_v61 = vsel %vm3412_vm15, %v1910_v56, %v1905_v14  ;;  %vm3415_vm4 = vmmov %vm3410_vm1 }
 0x257   : > { %v1913_v62 = vpop.permute.xlu0 %1912  ;;  %v1918_v63 = vpop.permute.xlu1 %1917  ;;  %v1651_v3 = vpack.c.bf16 %v717_v59, %v716_v58  ;;  %v1654_v5 = vpack.c.bf16 %v720_v61, %v719_v60  ;;  %vm3413_vm15 = vcmp.lt.s32.totalorder %v2493_v18, 16 }
 0x258   : > { %v1915_v6 = vunpack.i.h.bf16 %v1913_v62  ;;  %v1914_v7 = vunpack.i.l.bf16 %v1913_v62  ;;  %v1920_v9 = vunpack.i.h.bf16 %v1918_v63  ;;  %v1919_v10 = vunpack.i.l.bf16 %v1918_v63  ;;  %vm3414_vm8 = vmmov %vm3413_vm15 }
 0x259   : > { %1653 = vmatprep.subr.msk.bf16.mxu1 %vm3328_vm12, %v1651_v3 }
 0x25a   : > { %v746_v4 = vsel %vm3413_vm15, %v1914_v7, %v1915_v6  ;;  %v749_v12 = vsel %vm3414_vm8, %v1915_v6, %v1914_v7  ;;  %v718_v13 = vsel %vm3410_vm1, %v1919_v10, %v1920_v9  ;;  %v721_v15 = vsel %vm3415_vm4, %v1920_v9, %v1919_v10  ;;  %1656 = vmatpush1.bf16.msk.msra.mxu1 %vm3416_vm14, %v1654_v5  ;;  %vm3417_vm15 = vmpackc.low %vm2512_vm9, %vm2505_vm7 }
 0x25b   : > { %v1657_v17 = vpack.c.bf16 %v746_v4, %v718_v13  ;;  %v1660_v19 = vpack.c.bf16 %v749_v12, %v721_v15  ;;  %v1933_v22 = vpop.permute.xlu0 %1932  ;;  %v1923_v23 = vpop.permute.xlu1 %1922  ;;  %vm3329_vm4 = vmpackc.low %vm2512_vm9, %vm2512_vm9 }
 0x25c   : > { %v1935_v25 = vunpack.i.h.bf16 %v1933_v22  ;;  %v1934_v27 = vunpack.i.l.bf16 %v1933_v22  ;;  %v1925_v2 = vunpack.i.h.bf16 %v1923_v23  ;;  %v1924_v28 = vunpack.i.l.bf16 %v1923_v23  ;;  %vm3418_vm14 = vmmov %vm3414_vm8 }
 0x25d   : > { %1659 = vmatprep.subr.msk.bf16.mxu1 %vm3417_vm15, %v1657_v17  ;;  %vm3419_vm1 = vmmov %vm3414_vm8 }
 0x25e   : > { %v748_v30 = vsel %vm3418_vm14, %v1925_v2, %v1935_v25  ;;  %v751_v41 = vsel %vm3414_vm8, %v1935_v25, %v1925_v2  ;;  %v747_v45 = vsel %vm3419_vm1, %v1924_v28, %v1934_v27  ;;  %vm3420_vm12 = vmmov %vm3419_vm1 }
 0x25f   : > { %v750_v46 = vsel %vm3420_vm12, %v1934_v27, %v1924_v28  ;;  %vm3421_vm15 = vmpackc.low %vm2522_vm13, %vm2516_vm10  ;;  %v1663_v49 = vpack.c.bf16 %v748_v30, %v747_v45  ;;  %v1938_v51 = vpop.permute.xlu0 %1937  ;;  %v1928_v52 = vpop.permute.xlu1 %1927  ;;  %vm3422_vm12 = vcmp.lt.s32.totalorder %v2493_v18, 15 }
 0x260   : > { %1662 = vmatpush1.bf16.msk.msra.mxu1 %vm3421_vm15, %v1660_v19  ;;  %v1666_v50 = vpack.c.bf16 %v751_v41, %v750_v46  ;;  %vm3332_vm14 = vmpackc.low %vm2522_vm13, %vm2522_vm13  ;;  %v1940_v14 = vunpack.i.h.bf16 %v1938_v51  ;;  %v1939_v53 = vunpack.i.l.bf16 %v1938_v51  ;;  %v1930_v55 = vunpack.i.h.bf16 %v1928_v52 }
 0x261   : > { %v1929_v56 = vunpack.i.l.bf16 %v1928_v52  ;;  %1665 = vmatprep.subr.msk.bf16.mxu1 %vm3329_vm4, %v1663_v49  ;;  %vm3423_vm8 = vmmov %vm3422_vm12  ;;  %vm3426_vm4 = vnez %v3376_v38 }
 0x262   : > { %v777_v57 = vsel %vm3422_vm12, %v1930_v55, %v1940_v14  ;;  %v780_v58 = vsel %vm3423_vm8, %v1940_v14, %v1930_v55  ;;  %vm3424_vm1 = vmmov %vm3423_vm8  ;;  %vm3427_vm8 = vcmp.lt.s32.totalorder %v2493_v18, 1 }
 0x263   : > { %v776_v59 = vsel %vm3424_vm1, %v1929_v56, %v1939_v53  ;;  %vm3425_vm15 = vmmov %vm3424_vm1  ;;  %v1943_v63 = vpop.permute.xlu0 %1942  ;;  %v1948_v3 = vpop.permute.xlu1 %1947 }
 0x264   : > { %v779_v60 = vsel %vm3425_vm15, %v1939_v53, %v1929_v56  ;;  %1668 = vmatpush1.bf16.msk.msra.mxu1 %vm3332_vm14, %v1666_v50  ;;  %vm3334_vm9 = vmpackc.low %vm3426_vm4, %vm3426_vm4  ;;  %v1669_v61 = vpack.c.bf16 %v777_v57, %v776_v59  ;;  %v1945_v5 = vunpack.i.h.bf16 %v1943_v63  ;;  %v1944_v6 = vunpack.i.l.bf16 %v1943_v63 }
 0x265   : > { %v1672_v62 = vpack.c.bf16 %v780_v58, %v779_v60  ;;  %vm3333_vm12 = vmpackc.low %vm2534_vm2, %vm2534_vm2  ;;  %v1950_v7 = vunpack.i.h.bf16 %v1948_v3  ;;  %v1949_v9 = vunpack.i.l.bf16 %v1948_v3 }
 0x266   : > { %1671 = vmatprep.subr.msk.bf16.mxu1 %vm3334_vm9, %v1669_v61  ;;  %v806_v10 = vsel %vm3427_vm8, %v1944_v6, %v1945_v5  ;;  %vm3428_vm1 = vmmov %vm3427_vm8  ;;  %vm3430_vm8 = vnez %v3378_v43 }
 0x267   : > { %v809_v4 = vsel %vm3428_vm1, %v1945_v5, %v1944_v6  ;;  %v778_v12 = vsel %vm3425_vm15, %v1949_v9, %v1950_v7  ;;  %vm3429_vm14 = vmmov %vm3425_vm15  ;;  %v1958_v19 = vpop.permute.xlu0 %1957  ;;  %v1953_v22 = vpop.permute.xlu1 %1952 }
 0x268   : > { %v781_v13 = vsel %vm3429_vm14, %v1950_v7, %v1949_v9  ;;  %1674 = vmatpush1.bf16.msk.msra.mxu1 %vm3333_vm12, %v1672_v62  ;;  %v1675_v15 = vpack.c.bf16 %v806_v10, %v778_v12  ;;  %v1960_v23 = vunpack.i.h.bf16 %v1958_v19  ;;  %v1959_v25 = vunpack.i.l.bf16 %v1958_v19  ;;  %vm3431_vm1 = vmpackc.low %vm3430_vm8, %vm3426_vm4 }
 0x269   : > { %v1678_v17 = vpack.c.bf16 %v809_v4, %v781_v13  ;;  %v1955_v27 = vunpack.i.h.bf16 %v1953_v22  ;;  %v1954_v2 = vunpack.i.l.bf16 %v1953_v22  ;;  %vm3432_vm14 = vcmp.lt.s32.totalorder %v2493_v18, 1  ;;  %vm3436_vm13 = vmpackc.low %vm2540_vm11, %vm2534_vm2 }
 0x26a   : > { %1677 = vmatprep.subr.msk.bf16.mxu1 %vm3431_vm1, %v1675_v15  ;;  %vm3433_vm15 = vmmov %vm3432_vm14 }
 0x26b   : > { %v808_v28 = vsel %vm3432_vm14, %v1955_v27, %v1960_v23  ;;  %v811_v30 = vsel %vm3433_vm15, %v1960_v23, %v1955_v27  ;;  %vm3434_vm12 = vmmov %vm3432_vm14  ;;  %v1968_v50 = vpop.permute.xlu0 %1967  ;;  %v1963_v51 = vpop.permute.xlu1 %1962 }
 0x26c   : > { %v807_v41 = vsel %vm3434_vm12, %v1954_v2, %v1959_v25  ;;  %vm3435_vm9 = vmmov %vm3434_vm12  ;;  %1680 = vmatpush1.bf16.msk.msra.mxu1 %vm3436_vm13, %v1678_v17  ;;  %v1965_v52 = vunpack.i.h.bf16 %v1963_v51  ;;  %v1964_v14 = vunpack.i.l.bf16 %v1963_v51  ;;  %v1970_v57 = vunpack.i.h.bf16 %v1968_v50 }
 0x26d   : > { %v810_v45 = vsel %vm3435_vm9, %v1959_v25, %v1954_v2  ;;  %vm3341_vm1 = vmpackc.low %vm3430_vm8, %vm3430_vm8  ;;  %v1681_v46 = vpack.c.bf16 %v808_v28, %v807_v41  ;;  %vm3437_vm9 = vcmp.lt.s32.totalorder %v2493_v18, 127  ;;  %v1969_v58 = vunpack.i.l.bf16 %v1968_v50 }
 0x26e   : > { %v1684_v49 = vpack.c.bf16 %v811_v30, %v810_v45  ;;  %vm3337_vm12 = vmpackc.low %vm2540_vm11, %vm2540_vm11  ;;  %v845_v53 = vsel %vm3437_vm9, %v1965_v52, %v1964_v14 }
 0x26f   : > { %1683 = vmatprep.subr.msk.bf16.mxu1 %vm3341_vm1, %v1681_v46  ;;  %v1973_v55 = vpop.permute.xlu0 %1972  ;;  %v1978_v56 = vpop.permute.xlu1 %1977  ;;  %vm3438_vm13 = vmmov %vm3437_vm9  ;;  %v1691_v62 = vpack.c.bf16 %v845_v53, %v2728_v40 }
 0x270   : > { %1686 = vmatpush1.bf16.msk.msra.mxu1 %vm3337_vm12, %v1684_v49  ;;  %v1980_v59 = vunpack.i.h.bf16 %v1978_v56  ;;  %v1979_v60 = vunpack.i.l.bf16 %v1978_v56  ;;  %v842_v61 = vsel %vm3438_vm13, %v1964_v14, %v1965_v52  ;;  %vm3439_vm14 = vmmov %vm3437_vm9  ;;  %v1975_v5 = vunpack.i.h.bf16 %v1973_v55 }
 0x271   : > { %1688 = vmatprep.subr.bf16.mxu1 %v1687_v39  ;;  %vm3440_vm15 = vmmov %vm3437_vm9  ;;  %v1694_v39 = vpack.c.bf16 %v842_v61, %v2723_v31  ;;  %vm3441_vm9 = vnez %v3384_v20  ;;  %v1974_v7 = vunpack.i.l.bf16 %v1973_v55  ;;  %vm3443_vm12 = vcmp.lt.s32.totalorder %v2493_v18, 113 }
 0x272   : > { %v847_v63 = vsel %vm3439_vm14, %v1980_v59, %v1970_v57  ;;  %v846_v3 = vsel %vm3440_vm15, %v1979_v60, %v1969_v58  ;;  %vm3338_vm13 = vmpackc.low %vm3441_vm9, %vm3441_vm9  ;;  %v844_v9 = vsel %vm3439_vm14, %v1970_v57, %v1980_v59 }
 0x273   : > { %v1993_v11 = vpop.permute.xlu0 %1992  ;;  %v1983_v24 = vpop.permute.xlu1 %1982  ;;  %vm3442_vm15 = vmmov %vm3439_vm14  ;;  %v1697_v21 = vpack.c.bf16 %v847_v63, %v846_v3  ;;  %vm3445_vm14 = vnez %v3388_v26 }
 0x274   : > { %1690 = vmatpush1.bf16.msra.mxu1 %v1689_v42  ;;  %v1985_v6 = vunpack.i.h.bf16 %v1983_v24  ;;  %v1984_v40 = vunpack.i.l.bf16 %v1983_v24  ;;  %v843_v8 = vsel %vm3442_vm15, %v1969_v58, %v1979_v60  ;;  %vm3339_vm15 = vmpackc.low %vm3445_vm14, %vm3445_vm14  ;;  %v1995_v12 = vunpack.i.h.bf16 %v1993_v11 }
 0x275   : > { %1693 = vmatprep.subr.msk.bf16.mxu1 %vm2625_vm0, %v1691_v62  ;;  %vm3444_vm0 = vmmov %vm3443_vm12  ;;  %v1700_v4 = vpack.c.bf16 %v844_v9, %v843_v8  ;;  %v1994_v13 = vunpack.i.l.bf16 %v1993_v11  ;;  %v950_v8 = vld [vmem:[%s3289_s4] sm:$0xff] }
 0x276   : > { %v876_v32 = vsel %vm3443_vm12, %v1985_v6, %v1975_v5  ;;  %v875_v31 = vsel %vm3444_vm0, %v1984_v40, %v1974_v7  ;;  %vm3340_vm12 = vmpackc.low %vm2629_vm5, %vm2629_vm5  ;;  %v872_v15 = vsel %vm3444_vm0, %v1974_v7, %v1984_v40 }
 0x277   : > { %v1998_v42 = vpop.permute.xlu0 %1997  ;;  %v1988_v10 = vpop.permute.xlu1 %1987  ;;  %v1703_v17 = vpack.c.bf16 %v876_v32, %v875_v31  ;;  %v877_v27 = vsel %vm3444_vm0, %v1995_v12, %v1994_v13  ;;  %v953_v32 = vld [vmem:[%s3289_s4 + $0x18] sm:$0xff]  ;;  %v952_v31 = vld [vmem:[%s3289_s4 + $0x10] sm:$0xff] }
 0x278   : > { %1696 = vmatpush1.bf16.msk.msra.mxu1 %vm2655_vm6, %v1694_v39  ;;  %vm3446_vm6 = vmmov %vm3444_vm0  ;;  %v1990_v19 = vunpack.i.h.bf16 %v1988_v10  ;;  %v1989_v22 = vunpack.i.l.bf16 %v1988_v10  ;;  %v2000_v28 = vunpack.i.h.bf16 %v1998_v42  ;;  %v1999_v41 = vunpack.i.l.bf16 %v1998_v42 }
 0x279   : > { %1699 = vmatprep.subr.msk.bf16.mxu1 %vm3338_vm13, %v1697_v21  ;;  %v873_v0 = vsel %vm3446_vm6, %v1975_v5, %v1985_v6  ;;  %vm3447_vm13 = vcmp.lt.s32.totalorder %v2493_v18, 112  ;;  %vm3342_vm6 = vmpackc.low %vm2663_vm3, %vm2663_vm3 }
 0x27a   : > { %v905_v23 = vsel %vm3447_vm13, %v1990_v19, %v1989_v22  ;;  %v1706_v2 = vpack.c.bf16 %v873_v0, %v872_v15 }
 0x27b   : > { %v2008_v25 = vpop.permute.xlu1 %2007  ;;  %v1709_v45 = vpack.c.bf16 %v905_v23, %v877_v27  ;;  %v2003_v46 = vpop.permute.xlu0 %2002 }
 0x27c   : > { %1702 = vmatpush1.bf16.msk.msra.mxu1 %vm3339_vm15, %v1700_v4  ;;  %vm3448_vm15 = vmmov %vm3447_vm13  ;;  %v2010_v49 = vunpack.i.h.bf16 %v2008_v25  ;;  %v2009_v50 = vunpack.i.l.bf16 %v2008_v25  ;;  %v2005_v56 = vunpack.i.h.bf16 %v2003_v46  ;;  %v2004_v57 = vunpack.i.l.bf16 %v2003_v46 }
 0x27d   : > { %1705 = vmatprep.subr.msk.bf16.mxu1 %vm3340_vm12, %v1703_v17  ;;  %v902_v30 = vsel %vm3448_vm15, %v1989_v22, %v1990_v19  ;;  %vm3449_vm13 = vmmov %vm3444_vm0  ;;  %vm3452_vm12 = vnez %v3394_v36 }
 0x27e   : > { %v874_v51 = vsel %vm3449_vm13, %v1994_v13, %v1995_v12  ;;  %vm3450_vm0 = vmmov %vm3448_vm15 }
 0x27f   : > { %v1712_v52 = vpack.c.bf16 %v902_v30, %v874_v51  ;;  %v907_v14 = vsel %vm3450_vm0, %v2010_v49, %v2000_v28  ;;  %vm3451_vm15 = vmmov %vm3450_vm0  ;;  %v2013_v55 = vpop.permute.xlu1 %2012  ;;  %v904_v60 = vsel %vm3450_vm0, %v2000_v28, %v2010_v49  ;;  %v925_v7 = vpop.permute.xlu0 %924 }
 0x280   : > { %1708 = vmatpush1.bf16.msk.msra.mxu1 %vm3342_vm6, %v1706_v2  ;;  %v906_v53 = vsel %vm3451_vm15, %v2009_v50, %v1999_v41  ;;  %vm3453_vm1 = vmpackc.low %vm3452_vm12, %vm2629_vm5  ;;  %v2015_v58 = vunpack.i.h.bf16 %v2013_v55  ;;  %v2014_v59 = vunpack.i.l.bf16 %v2013_v55  ;;  %vm3455_vm6 = vcmp.lt.s32.totalorder %v2493_v18, 111 }
 0x281   : > { %1711 = vmatprep.subr.msk.bf16.mxu1 %vm3453_vm1, %v1709_v45  ;;  %vm3346_vm13 = vmpackc.low %vm3452_vm12, %vm3452_vm12  ;;  %v1715_v62 = vpack.c.bf16 %v907_v14, %v906_v53  ;;  %vm3457_vm5 = vnez %v3404_v47  ;;  %v1318_v14 = vld [vmem:[%s3292_s7] sm:$0xff] }
 0x282   : > { %vm3454_vm15 = vmmov %vm3450_vm0  ;;  %v936_v63 = vsel %vm3455_vm6, %v2015_v58, %v2005_v56 }
 0x283   : > { %v903_v61 = vsel %vm3454_vm15, %v1999_v41, %v2009_v50  ;;  %vm3456_vm1 = vmmov %vm3455_vm6  ;;  %vm3459_vm6 = vnez %v3406_v54  ;;  %v931_v6 = vpop.permute.xlu1 %930 }
 0x284   : > { %v935_v3 = vsel %vm3456_vm1, %v2014_v59, %v2004_v57  ;;  %vm3458_vm14 = vmpackc.low %vm3457_vm5, %vm2663_vm3  ;;  %v1718_v11 = vpack.c.bf16 %v904_v60, %v903_v61  ;;  %v933_v24 = vsel %vm3456_vm1, %v2005_v56, %v2015_v58 }
 0x285   : > { %1714 = vmatpush1.bf16.msk.msra.mxu1 %vm3458_vm14, %v1712_v52  ;;  %vm3349_vm0 = vmpackc.low %vm3457_vm5, %vm3457_vm5  ;;  %v1721_v5 = vpack.c.bf16 %v936_v63, %v935_v3  ;;  %v1281_v52 = vld [vmem:[#allocation8 + $0x8] sm:$0xff] }
 0x286   : > { %1717 = vmatprep.subr.msk.bf16.mxu1 %vm3346_vm13, %v1715_v62  ;;  %vm3347_vm15 = vmpackc.low %vm3459_vm6, %vm3459_vm6  ;;  %vm3461_vm13 = vnez %v3408_v16 }
 0x287   : > { %vm3460_vm14 = vmmov %vm3456_vm1 }
 0x288   : > { %v932_v39 = vsel %vm3460_vm14, %v2004_v57, %v2014_v59  ;;  %vm3348_vm1 = vmpackc.low %vm3461_vm13, %vm3461_vm13  ;;  %v937_v9 = vsel %vm3460_vm14, %v931_v6, %v925_v7 }
 0x289   : > { %1720 = vmatpush1.bf16.msk.msra.mxu1 %vm3349_vm0, %v1718_v11  ;;  %v1724_v40 = vpack.c.bf16 %v933_v24, %v932_v39 }
 0x28a   : > { %1723 = vmatprep.subr.msk.bf16.mxu1 %vm3347_vm15, %v1721_v5  ;;  %vm3462_vm15 = vmmov %vm3460_vm14  ;;  %vm3463_vm14 = vcmask 719872  }
 0x28b   : > { %v934_v21 = vsel %vm3462_vm15, %v925_v7, %v931_v6 }
 0x28d   : > { %1726 = vmatpush1.bf16.msk.msra.mxu1 %vm3348_vm1, %v1724_v40 }
 0x28e   : > { %1593 = vmatprep.subr.msk.mxu1 %vm3459_vm6, %v937_v9  ;;  %vm3473_vm6 = vmpackc.low %vm2516_vm10, %vm2516_vm10 }
 0x290   : > { %v1013_v42 = vpop.permute.xlu0 %1012 }
 0x291   : > { %1594 = vmatpush1.msk.msra.mxu1 %vm3461_vm13, %v934_v21 }
 0x292   : > { %1092 = vmatmul.mubr.f32.vlgmr.msra.gmra.mrb[0].mxu1 %v950_v8 }
 0x293   : > { %1523 = vmatprep.mubr.msk.f32.mxu1 %vm3463_vm14, %v953_v32 }
 0x294   : > { %v1018_v0 = vpop.permute.xlu1 %1017 }
 0x296   : > { %1098 = vmatmul.mubr.f32.gmra.mrb[2].mxu1 %v952_v31 }
 0x365   : > { %v1093_v10 = vpop.f32.mrb[0].mxu1 }
 0x366   : > { %v1094_v4 = vadd.f32 %v1093_v10, %v1013_v42  ;;  %v1095_v12 = vpop.f32.mrb[1].mxu1 }
 0x367   : > { %v1096_v13 = vadd.f32 %v1095_v12, %v1013_v42 }
 0x368   : > { %v1108_v17 = vmul.f32 0.001, %v1094_v4  ;;  %vm1104_vm15 = vcmp.gt.f32.partialorder %v1094_v4, 0.0 }
 0x369   : > { %v1099_v15 = vpop.f32.mrb[2].mxu1  ;;  %v1109_v19 = vmul.f32 0.001, %v1096_v13  ;;  %vm1105_vm1 = vcmp.gt.f32.partialorder %v1096_v13, 0.0 }
 0x36a   : > { %v1100_v22 = vadd.f32 %v1099_v15, %v1018_v0  ;;  %v1101_v23 = vpop.f32.mrb[3].mxu1  ;;  %v3053_v28 = vsel %vm1104_vm15, %v1094_v4, %v1108_v17 }
 0x36b   : > { %v1102_v25 = vadd.f32 %v1101_v23, %v1018_v0  ;;  %v3055_v30 = vsel %vm1105_vm1, %v1096_v13, %v1109_v19  ;;  %vm3464_vm1 = vcmp.lt.s32.totalorder %v2493_v18, 17 }
 0x36c   : > { %vm1106_vm14 = vcmp.gt.f32.partialorder %v1100_v22, 0.0  ;;  %v1110_v27 = vmul.f32 0.001, %v1100_v22  ;;  %vm3465_vm15 = vmmov %vm3464_vm1 }
 0x36d   : > { %vm1107_vm0 = vcmp.gt.f32.partialorder %v1102_v25, 0.0  ;;  %v1111_v2 = vmul.f32 0.001, %v1102_v25 }
 0x36e   : > { %v3057_v41 = vsel %vm1106_vm14, %v1100_v22, %v1110_v27  ;;  %vm3466_vm14 = vmmov %vm3464_vm1 }
 0x36f   : > { %v3059_v45 = vsel %vm1107_vm0, %v1102_v25, %v1111_v2  ;;  %v2016_v46 = vpack.i.bf16 %v3057_v41, %v3053_v28  ;;  %v1753_v51 = vpack.c.bf16 %v3057_v41, %v3053_v28  ;;  %vm1324_vm0 = vcmask 130048  }
 0x370   : > { %v2036_v49 = vpack.i.bf16 %v3059_v45, %v3055_v30  ;;  %v1751_v50 = vpack.c.bf16 %v3059_v45, %v3055_v30  ;;  %1524 = vmatprep.mubr.msk.f32.mxu0 %vm1324_vm0, %v1281_v52  ;;  %vm3467_vm0 = vmmov %vm3464_vm1 }
 0x371   : > { %2017 = vrot.lane.b32.xlu0 %v2016_v46, %s2261_s24 }
 0x372   : > { %2037 = vrot.lane.b32.xlu1 %v2036_v49, %s2261_s24 }
 0x375   : > { %2022 = vrot.lane.b32.xlu0 %v2016_v46, %s2263_s25 }
 0x376   : > { %2042 = vrot.lane.b32.xlu1 %v2036_v49, %s2263_s25 }
 0x379   : > { %2027 = vrot.lane.b32.xlu0 %v2016_v46, %s2260_s23 }
 0x37a   : > { %2047 = vrot.lane.b32.xlu1 %v2036_v49, %s2260_s23 }
 0x37d   : > { %2032 = vrot.lane.b32.xlu0 %v2016_v46, %s2262_s26 }
 0x37e   : > { %2052 = vrot.lane.b32.xlu1 %v2036_v49, %s2262_s26  ;;  %s339_s26 = sand.u32 1, %s2242_s28  }
 0x37f   : > { %s1516_s25 = sshll.u32 %s339_s26, 4 }
 0x381   : > { %2057 = vrot.lane.b32.xlu0 %v2016_v46, %s2264_s10 }
 0x382   : > { %2077 = vrot.lane.b32.xlu1 %v2036_v49, %s2264_s10  ;;  %s1530_s10 = sshll.u32 %s2337_s9, 8  ;;  %s1402_s9 = scalar_lea.sflag [#allocation5], %s339_s26 }
 0x383   : > { %s3243_s22 = scalar_lea.hbm %s3293_s8, %s1530_s10 }
 0x385   : > { %2062 = vrot.lane.b32.xlu0 %v2016_v46, %s2265_s13 }
 0x386   : > { %2082 = vrot.lane.b32.xlu1 %v2036_v49, %s2265_s13  ;;  %s341_s13 = scalar_lea.vmem [#allocation9], %s1516_s25 }
 0x389   : > { %2067 = vrot.lane.b32.xlu0 %v2016_v46, %s2266_s18 }
 0x38a   : > { %2087 = vrot.lane.b32.xlu1 %v2036_v49, %s2266_s18  ;;  %s1416_s18 = sshll.u32 %s341_s13, 4  ;;  %s3245_s18 = int_to_ptr.vmem [resolvable:$true] %s1416_s18 }
 0x38b   : > { %s2180_s29 = scalar_lea.vmem %s3245_s18, 256  ;;  %p2187_p4 = scmp.lt.s32.totalorder %s3245_s18, %s2185_s2 }
 0x38c   : > { %p2181_p12 = scmp.ne.s32.totalorder %s3245_s18, %s2180_s29  ;;  %p2188_p7 = scmp.lt.s32.totalorder %s2186_s17, %s2180_s29 }
 0x38d   : > { %2072 = vrot.lane.b32.xlu0 %v2016_v46, %s2267_s21 }
 0x38e   : > { %2092 = vrot.lane.b32.xlu1 %v2036_v49, %s2267_s21  ;;  %p2182_p2 = pnand %p2181_p12, %p3518_p1  ;;  %p2189_p8 = por %p2188_p7, %p2187_p4 }
 0x390   : > { %p2183_p3 = pneg %p2182_p2 }
 0x391   : > { %1321 = vperm.xlu0 %1900, %v1318_v14  }
 0x392   : > { %p2190_p11 = pnand %p2189_p8, %p2183_p3 }
 0x3e3   : > { %v2018_v53 = vpop.permute.xlu0 %2017 }
 0x3e4   : > { %v2020_v55 = vunpack.i.h.bf16 %v2018_v53  ;;  %v2019_v56 = vunpack.i.l.bf16 %v2018_v53  ;;  %v2038_v57 = vpop.permute.xlu1 %2037 }
 0x3e5   : > { %v2040_v58 = vunpack.i.h.bf16 %v2038_v57  ;;  %v2039_v59 = vunpack.i.l.bf16 %v2038_v57 }
 0x3e7   : > { %v1124_v60 = vsel %vm3464_vm1, %v2019_v56, %v2039_v59  ;;  %v1125_v61 = vsel %vm3465_vm15, %v2020_v55, %v2040_v58  ;;  %v1126_v62 = vsel %vm3466_vm14, %v2039_v59, %v2019_v56  ;;  %v1127_v63 = vsel %vm3467_vm0, %v2040_v58, %v2020_v55  ;;  %v2023_v3 = vpop.permute.xlu0 %2022  ;;  %vm3468_vm1 = vmpackc.low %vm2505_vm7, %vm2505_vm7 }
 0x3e8   : > { %v1727_v11 = vpack.c.bf16 %v1125_v61, %v1124_v60  ;;  %v1730_v24 = vpack.c.bf16 %v1127_v63, %v1126_v62  ;;  %v2025_v39 = vunpack.i.h.bf16 %v2023_v3  ;;  %v2024_v5 = vunpack.i.l.bf16 %v2023_v3  ;;  %v2043_v6 = vpop.permute.xlu1 %2042 }
 0x3e9   : > { %v2045_v40 = vunpack.i.h.bf16 %v2043_v6  ;;  %v2044_v7 = vunpack.i.l.bf16 %v2043_v6  ;;  %vm3469_vm15 = vcmp.lt.s32.totalorder %v2493_v18, 16  ;;  %vm3474_vm7 = vnez %v3370_v34 }
 0x3ea   : > { %1729 = vmatprep.subr.msk.bf16.mxu0 %vm3468_vm1, %v1727_v11  ;;  %vm3470_vm14 = vmmov %vm3469_vm15 }
 0x3eb   : > { %v1144_v9 = vsel %vm3469_vm15, %v2024_v5, %v2044_v7  ;;  %v1145_v8 = vsel %vm3470_vm14, %v2025_v39, %v2045_v40  ;;  %vm3471_vm0 = vmmov %vm3470_vm14  ;;  %v2028_v31 = vpop.permute.xlu0 %2027  ;;  %1732 = vmatpush1.bf16.msk.msra.mxu0 %vm3473_vm6, %v1730_v24  ;;  %vm3480_vm14 = vnez %v3374_v37 }
 0x3ec   : > { %v1146_v21 = vsel %vm3471_vm0, %v2044_v7, %v2024_v5  ;;  %vm3472_vm13 = vmmov %vm3471_vm0  ;;  %v1733_v29 = vpack.c.bf16 %v1145_v8, %v1144_v9  ;;  %v2030_v10 = vunpack.i.h.bf16 %v2028_v31  ;;  %v2029_v4 = vunpack.i.l.bf16 %v2028_v31  ;;  %v2048_v12 = vpop.permute.xlu1 %2047 }
 0x3ed   : > { %v1147_v32 = vsel %vm3472_vm13, %v2045_v40, %v2025_v39  ;;  %v2050_v13 = vunpack.i.h.bf16 %v2048_v12  ;;  %v2049_v0 = vunpack.i.l.bf16 %v2048_v12  ;;  %vm3475_vm1 = vmpackc.low %vm3474_vm7, %vm3474_vm7  ;;  %vm3476_vm13 = vcmp.lt.s32.totalorder %v2493_v18, 15 }
 0x3ee   : > { %v1736_v42 = vpack.c.bf16 %v1147_v32, %v1146_v21  ;;  %1735 = vmatprep.subr.msk.bf16.mxu0 %vm3475_vm1, %v1733_v29  ;;  %vm3477_vm15 = vmmov %vm3476_vm13  ;;  %vm3483_vm1 = vcmp.lt.s32.totalorder %v2493_v18, 1 }
 0x3ef   : > { %v1164_v15 = vsel %vm3476_vm13, %v2029_v4, %v2049_v0  ;;  %v1165_v35 = vsel %vm3477_vm15, %v2030_v10, %v2050_v13  ;;  %vm3478_vm10 = vmmov %vm3476_vm13  ;;  %v2033_v22 = vpop.permute.xlu0 %2032 }
 0x3f0   : > { %v1166_v17 = vsel %vm3478_vm10, %v2049_v0, %v2029_v4  ;;  %vm3479_vm6 = vmmov %vm3478_vm10  ;;  %v1739_v34 = vpack.c.bf16 %v1165_v35, %v1164_v15  ;;  %v2035_v25 = vunpack.i.h.bf16 %v2033_v22  ;;  %v2034_v27 = vunpack.i.l.bf16 %v2033_v22  ;;  %v2053_v2 = vpop.permute.xlu1 %2052 }
 0x3f1   : > { %v1167_v19 = vsel %vm3479_vm6, %v2050_v13, %v2030_v10  ;;  %vm3481_vm0 = vmpackc.low %vm3480_vm14, %vm3480_vm14  ;;  %v2055_v46 = vunpack.i.h.bf16 %v2053_v2  ;;  %v2054_v49 = vunpack.i.l.bf16 %v2053_v2  ;;  %vm3489_vm14 = vcmp.lt.s32.totalorder %v2493_v18, 127 }
 0x3f2   : > { %1738 = vmatpush1.bf16.msk.msra.mxu0 %vm3481_vm0, %v1736_v42  ;;  %v1742_v23 = vpack.c.bf16 %v1167_v19, %v1166_v17  ;;  %vm3482_vm7 = vmpackc.low %vm3426_vm4, %vm3426_vm4 }
 0x3f3   : > { %1741 = vmatprep.subr.msk.bf16.mxu0 %vm3482_vm7, %v1739_v34  ;;  %v1184_v52 = vsel %vm3483_vm1, %v2034_v27, %v2054_v49  ;;  %vm3484_vm13 = vmmov %vm3483_vm1  ;;  %v2058_v55 = vpop.permute.xlu0 %2057 }
 0x3f4   : > { %v1185_v37 = vsel %vm3484_vm13, %v2035_v25, %v2055_v46  ;;  %vm3485_vm15 = vmmov %vm3483_vm1  ;;  %v2060_v57 = vunpack.i.h.bf16 %v2058_v55  ;;  %v2059_v58 = vunpack.i.l.bf16 %v2058_v55  ;;  %v2078_v59 = vpop.permute.xlu1 %2077 }
 0x3f5   : > { %v1186_v14 = vsel %vm3485_vm15, %v2054_v49, %v2034_v27  ;;  %vm3486_vm10 = vmmov %vm3483_vm1  ;;  %v1745_v38 = vpack.c.bf16 %v1185_v37, %v1184_v52  ;;  %v2080_v60 = vunpack.i.h.bf16 %v2078_v59  ;;  %v2079_v61 = vunpack.i.l.bf16 %v2078_v59 }
 0x3f6   : > { %v1187_v53 = vsel %vm3486_vm10, %v2055_v46, %v2035_v25  ;;  %vm3487_vm6 = vmpackc.low %vm2534_vm2, %vm2534_vm2  ;;  %vm3494_vm1 = vcmp.lt.s32.totalorder %v2493_v18, 113 }
 0x3f7   : > { %1744 = vmatpush1.bf16.msk.msra.mxu0 %vm3487_vm6, %v1742_v23  ;;  %v1748_v56 = vpack.c.bf16 %v1187_v53, %v1186_v14  ;;  %vm3488_vm4 = vmpackc.low %vm3430_vm8, %vm3430_vm8  ;;  %v1210_v62 = vsel %vm3489_vm14, %v2079_v61, %v2059_v58  ;;  %v2063_v63 = vpop.permute.xlu0 %2062  ;;  %vm3499_vm6 = vcmp.lt.s32.totalorder %v2493_v18, 112 }
 0x3f8   : > { %1747 = vmatprep.subr.msk.bf16.mxu0 %vm3488_vm4, %v1745_v38  ;;  %vm3490_vm0 = vmmov %vm3489_vm14  ;;  %v2065_v3 = vunpack.i.h.bf16 %v2063_v63  ;;  %v2064_v11 = vunpack.i.l.bf16 %v2063_v63  ;;  %v2083_v24 = vpop.permute.xlu1 %2082 }
 0x3f9   : > { %v1211_v44 = vsel %vm3490_vm0, %v2080_v60, %v2060_v57  ;;  %vm3491_vm2 = vmpackc.low %vm2540_vm11, %vm2540_vm11  ;;  %v2085_v43 = vunpack.i.h.bf16 %v2083_v24  ;;  %v2084_v39 = vunpack.i.l.bf16 %v2083_v24 }
 0x3fa   : > { %vm3492_vm8 = vmmov %vm3490_vm0  ;;  %v1755_v40 = vpack.c.bf16 %v1211_v44, %v1210_v62 }
 0x3fb   : > { %1750 = vmatpush1.bf16.msk.msra.mxu0 %vm3491_vm2, %v1748_v56  ;;  %v1208_v5 = vsel %vm3492_vm8, %v2059_v58, %v2079_v61  ;;  %vm3493_vm7 = vmmov %vm3490_vm0  ;;  %v1230_v48 = vsel %vm3494_vm1, %v2084_v39, %v2064_v11  ;;  %v2068_v9 = vpop.permute.xlu0 %2067  ;;  %vm3503_vm0 = vnez %v3392_v33 }
 0x3fc   : > { %1752 = vmatprep.subr.bf16.mxu0 %v1751_v50  ;;  %v1209_v6 = vsel %vm3493_vm7, %v2060_v57, %v2080_v60  ;;  %vm3495_vm11 = vmmov %vm3494_vm1  ;;  %v2070_v30 = vunpack.i.h.bf16 %v2068_v9  ;;  %v2069_v45 = vunpack.i.l.bf16 %v2068_v9  ;;  %v2088_v50 = vpop.permute.xlu1 %2087 }
 0x3fd   : > { %v1231_v7 = vsel %vm3495_vm11, %v2085_v43, %v2065_v3  ;;  %vm3496_vm13 = vmpackc.low %vm3441_vm9, %vm3441_vm9  ;;  %v1758_v8 = vpack.c.bf16 %v1209_v6, %v1208_v5  ;;  %v2090_v21 = vunpack.i.h.bf16 %v2088_v50  ;;  %v2089_v32 = vunpack.i.l.bf16 %v2088_v50 }
 0x3fe   : > { %vm3497_vm15 = vmmov %vm3494_vm1  ;;  %v1761_v28 = vpack.c.bf16 %v1231_v7, %v1230_v48  ;;  %vm3501_vm9 = vnez %v3388_v26 }
 0x3ff   : > { %1754 = vmatpush1.bf16.msra.mxu0 %v1753_v51  ;;  %v1228_v31 = vsel %vm3497_vm15, %v2064_v11, %v2084_v39  ;;  %vm3498_vm10 = vmmov %vm3494_vm1  ;;  %v1250_v41 = vsel %vm3499_vm6, %v2089_v32, %v2069_v45  ;;  %v2073_v42 = vpop.permute.xlu0 %2072  ;;  %vm3507_vm1 = vcmp.lt.s32.totalorder %v2493_v18, 111  ;;  %v1280_v18 = vld [vmem:[#allocation8] sm:$0xff] }
 0x400   : > { %1757 = vmatprep.subr.msk.bf16.mxu0 %vm3496_vm13, %v1755_v40  ;;  %v1229_v29 = vsel %vm3498_vm10, %v2065_v3, %v2085_v43  ;;  %vm3500_vm4 = vmmov %vm3499_vm6  ;;  %v2075_v20 = vunpack.i.h.bf16 %v2073_v42  ;;  %v2074_v10 = vunpack.i.l.bf16 %v2073_v42  ;;  %v2093_v4 = vpop.permute.xlu1 %2092 }
 0x401   : > { %v1251_v51 = vsel %vm3500_vm4, %v2090_v21, %v2070_v30  ;;  %vm3502_vm14 = vmpackc.low %vm3501_vm9, %vm3501_vm9  ;;  %v1764_v12 = vpack.c.bf16 %v1229_v29, %v1228_v31  ;;  %v2095_v13 = vunpack.i.h.bf16 %v2093_v4  ;;  %v2094_v0 = vunpack.i.l.bf16 %v2093_v4 }
 0x402   : > { %vm3504_vm2 = vmpackc.low %vm3503_vm0, %vm3503_vm0  ;;  %v1767_v35 = vpack.c.bf16 %v1251_v51, %v1250_v41  ;;  %vm3516_vm9 = vnez %v3408_v16 }
 0x403   : > { %1760 = vmatpush1.bf16.msk.msra.mxu0 %vm3502_vm14, %v1758_v8  ;;  %vm3505_vm8 = vmmov %vm3500_vm4  ;;  %v1270_v17 = vsel %vm3507_vm1, %v2094_v0, %v2074_v10 }
 0x404   : > { %1763 = vmatprep.subr.msk.bf16.mxu0 %vm3504_vm2, %v1761_v28  ;;  %v1248_v15 = vsel %vm3505_vm8, %v2069_v45, %v2089_v32  ;;  %vm3506_vm7 = vmmov %vm3500_vm4  ;;  %vm3514_vm4 = vnez %v3406_v54 }
 0x405   : > { %v1249_v26 = vsel %vm3506_vm7, %v2070_v30, %v2090_v21  ;;  %vm3508_vm11 = vmmov %vm3507_vm1 }
 0x406   : > { %v1271_v33 = vsel %vm3508_vm11, %v2095_v13, %v2075_v20  ;;  %vm3509_vm13 = vmpackc.low %vm2663_vm3, %vm2663_vm3  ;;  %v1770_v19 = vpack.c.bf16 %v1249_v26, %v1248_v15 }
 0x407   : > { %1766 = vmatpush1.bf16.msk.msra.mxu0 %vm3509_vm13, %v1764_v12  ;;  %vm3510_vm15 = vmpackc.low %vm3452_vm12, %vm3452_vm12  ;;  %v1773_v23 = vpack.c.bf16 %v1271_v33, %v1270_v17 }
 0x408   : > { %1769 = vmatprep.subr.msk.bf16.mxu0 %vm3510_vm15, %v1767_v35  ;;  %vm3511_vm10 = vmmov %vm3507_vm1 }
 0x409   : > { %v1268_v22 = vsel %vm3511_vm10, %v2074_v10, %v2094_v0  ;;  %vm3512_vm6 = vmmov %vm3507_vm1 }
 0x40a   : > { %v1269_v34 = vsel %vm3512_vm6, %v2075_v20, %v2095_v13  ;;  %vm3513_vm3 = vmpackc.low %vm3457_vm5, %vm3457_vm5 }
 0x40b   : > { %1772 = vmatpush1.bf16.msk.msra.mxu0 %vm3513_vm3, %v1770_v19  ;;  %vm3515_vm12 = vmpackc.low %vm3514_vm4, %vm3514_vm4  ;;  %v1776_v36 = vpack.c.bf16 %v1269_v34, %v1268_v22 }
 0x40c   : > { %1775 = vmatprep.subr.msk.bf16.mxu0 %vm3515_vm12, %v1773_v23  ;;  %vm3517_vm14 = vmpackc.low %vm3516_vm9, %vm3516_vm9 }
 0x40f   : > { %1778 = vmatpush1.bf16.msk.msra.mxu0 %vm3517_vm14, %v1776_v36 }
 0x410   : > { %v1322_v1 = vpop.permute.xlu0 %1321 }
 0x412   : > { %1393 = vmatmul.mubr.f32.vlgmr.msra.gmra.mrb[6].mxu0 %v1280_v18 }
 0x4e5   : > { %v1394_v47 = vpop.f32.mrb[6].mxu0 }
 0x4e6   : > { %v1395_v54 = vadd.f32 %v1394_v47, %v1322_v1  ;;  %v1396_v25 = vpop.f32.mrb[7].mxu0 }
 0x4e7   : > { %v1397_v27 = vadd.f32 %v1396_v25, %v1322_v1 }
 0x4e8   : > { %1399 = vst [vmem:[%s341_s13] sm:$0xff] %v1395_v54 }
 0x4e9   : > { %1400 = vst [vmem:[%s341_s13 + $0x8] sm:$0xff] %v1397_v27 }
 0x4ea   : > { %2193 = shalt.err (!%p2190_p11)
}
 0x4eb   : > { %s2194_s20 = scalar_lea.hbm %s3243_s22, 256  ;;  %s2198_s23 = scalar_lea.hbm %s3293_s8, 512 }
 0x4ec   : > { %p2195_p13 = scmp.ne.s32.totalorder %s3243_s22, %s2194_s20  ;;  %p2199_p6 = scmp.lt.u32.totalorder %s3243_s22, %s3293_s8 }
 0x4ed   : > { %p2200_p9 = scmp.lt.u32.totalorder %s2198_s23, %s2194_s20  ;;  %p2202_p12 = scmp.lt.u32.totalorder %s2194_s20, %s3243_s22 }
 0x4ee   : > { %p2196_p5 = pnand %p2195_p13, %p3518_p1 }
 0x4ef   : > { %p2201_p10 = por %p2200_p9, %p2199_p6 }
 0x4f0   : > { %p2197_p0 = pneg %p2196_p5 }
 0x4f1   : > { %p2203_p2 = por %p2202_p12, %p2201_p10 }
 0x4f3   : > { %p2204_p3 = pnand %p2203_p2, %p2197_p0 }
 0x4f5   : > { %2207 = shalt.err (!%p2204_p3)
}
 0x4f6   : > { %1791 = dma.vmem_to_hbm [thread:$0]  (%p3518_p1), %s3245_s18, 256, %s3243_s22, %s1402_s9  }
 0x4f7 PF: > { %p1813_p4 = scmp.ge.s32.totalorder %s2250_s30, 2  ;;  %s1428_s25 = sand.u32 1, %s2238_s27  }
 0x4f8   : > { %p3519_p7 = scmp.ne.s32.totalorder %s3357_s16, 0  ;;  %s1429_s10 = scalar_lea.sflag [#allocation5], %s1428_s25 }
 0x4fa   : > { %p1804_p8 = pnand %p1813_p4, %p3519_p7 }
 0x4fc   : > { %2233 = dma.done.wait (!%p1804_p8), %s1429_s10, 256  }
 0x4fd   : > { %2235 = vsyncadd (!%p1804_p8), %s1429_s10, 4294967040  ;;  %s3520_s30 = sld [smem:[#allocation14_spill]]  ;;  %s3521_s13 = sld [smem:[#allocation13_spill]] }
 0x4fe   : > { %s3522_s29 = sld [smem:[#allocation15_spill]]  ;;  %s3523_s27 = smov %s2242_s28 }
 0x503   : > { %p20_p11 = scmp.ge.s32.totalorder %s3520_s30, 4   ;;  %s3524_s28 = smov %s3521_s13 }
 0x505   :  { %22 = sbr.rel (!%p20_p11) target bundleno = 7 (0x7), region = 107 }
 0x50c   :  { %1434 = vsyncpa [#allocation4], 1 }
 0x50d   :  { %1436 = vsyncpa [#allocation4 + $0x1], 1 }
 0x50e   :  { %1437 = vsyncpa [#allocation7], 1 }
 0x50f   :  { %1438 = vsyncpa [#allocation5], 1 }
 0x510   :  { %1440 = vsyncpa [#allocation5 + $0x1], 1 }

</bundles_post_ra>
